<compile_context>
chip_gen: v7x
topology: tpu7x:2x2x1
jax: 0.10.0
libtpu: 0.0.40
codegen_flags: <defaults>
</compile_context>

<pallas_src>
import jax
import jax.numpy as jnp
from jax import lax
from jax.experimental import pallas as pl
from jax.experimental.pallas import tpu as pltpu

_INV_SQRT2 = 0.7071067811865476


def _gelu(x):
    # exact GELU (matches torch.nn.GELU / F.gelu defaults)
    return 0.5 * x * (1.0 + lax.erf(x * _INV_SQRT2))


# ---------------------------------------------------------------------------
# Fused kernel: 1x1 conv + GELU, then the chain of 3x3 depthwise dilated convs
# (+ GELU each), concatenated along channels.  One batch element per grid step;
# the running activation stays in VMEM the whole time.
# ---------------------------------------------------------------------------
def _make_fused_kernel(H, W, Cin, C, dilation):
    dmax = max(dilation)
    # Keep the interior write sublane-aligned: put the image at a column offset
    # that is a multiple of 8 (>= dmax so the left halo fits).
    col_off = -(-dmax // 8) * 8
    Hp = H + 2 * dmax
    Wp = col_off + W + dmax

    def kernel(x_ref, w0_ref, b0_ref, dw_w_ref, dw_b_ref, o_ref, hpad_ref):
        # ---- 1x1 conv (pointwise over channels) + GELU == matmul on the MXU.
        # Native-dtype operands, f32 accumulator (no f32-emulation passes).
        x2 = x_ref[0].reshape(H * W, Cin)
        h = jnp.dot(x2, w0_ref[...], preferred_element_type=jnp.float32)
        h = _gelu(h + b0_ref[...].astype(jnp.float32))
        h = h.reshape(H, W, C)                                  # f32

        # Zero the halo scratch.  Interior is overwritten before every conv;
        # the border stays zero (== Conv2d zero padding).  Re-zeroed every grid
        # step on purpose: with a 'parallel' batch axis the grid may be split
        # across TensorCores, so "zero only at step 0" would be unsafe.
        hpad_ref[...] = jnp.zeros_like(hpad_ref)

        outs = []
        for i, d in enumerate(dilation):
            # Place the current activation inside the zero border
            # (aligned store: col_off is a multiple of 8).
            hpad_ref[dmax:dmax + H, col_off:col_off + W, :] = h

            wk = dw_w_ref[i].astype(jnp.float32)                # (3, 3, C)
            bk = dw_b_ref[i].astype(jnp.float32)                # (C,)

            acc = jnp.zeros((H, W, C), jnp.float32)
            # 9 shifted taps, read straight from the VMEM ref at static offsets.
            for kh in range(3):
                for kw in range(3):
                    r0 = dmax + (kh - 1) * d
                    c0 = col_off + (kw - 1) * d
                    patch = hpad_ref[r0:r0 + H, c0:c0 + W, :]
                    acc = acc + patch * wk[kh, kw, :]

            h = _gelu(acc + bk)
            outs.append(h)

        # Single lane-dense store of all dilation outputs (C * len(dilation)).
        o_ref[0] = jnp.concatenate(outs, axis=-1).astype(o_ref.dtype)

    return kernel, (Hp, Wp)


# ---------------------------------------------------------------------------
# Module forward
# ---------------------------------------------------------------------------
def dilate_conv_layer(x, params, dilation):
    """x: (B, H, W, input_size) -> (B, H, W, channels * len(dilation))"""
    dilation = tuple(int(d) for d in dilation)
    B, H, W, Cin = x.shape
    C = params["base_w"].shape[1]
    D = len(dilation)

    dw_w = jnp.stack(params["dw_w"], axis=0)          # (D, 3, 3, C)
    dw_b = jnp.stack(params["dw_b"], axis=0)          # (D, C)
    b0 = params["base_b"].reshape(1, C)

    kern, (Hp, Wp) = _make_fused_kernel(H, W, Cin, C, dilation)

    return pl.pallas_call(
        kern,
        out_shape=jax.ShapeDtypeStruct((B, H, W, C * D), x.dtype),
        grid=(B,),
        in_specs=[
            pl.BlockSpec((1, H, W, Cin), lambda b: (b, 0, 0, 0)),
            pl.BlockSpec((Cin, C), lambda b: (0, 0)),
            pl.BlockSpec((1, C), lambda b: (0, 0)),
            pl.BlockSpec((D, 3, 3, C), lambda b: (0, 0, 0, 0)),
            pl.BlockSpec((D, C), lambda b: (0, 0)),
        ],
        out_specs=pl.BlockSpec((1, H, W, C * D), lambda b: (b, 0, 0, 0)),
        scratch_shapes=[pltpu.VMEM((Hp, Wp, C), jnp.float32)],
        compiler_params=pltpu.CompilerParams(dimension_semantics=("parallel",)),
    )(x, params["base_w"], b0, dw_w, dw_b)


# ---------------------------------------------------------------------------
# Params + plain-JAX reference for the sanity check
# ---------------------------------------------------------------------------
def init_params(key, input_size, channels, num_dilations):
    keys = jax.random.split(key, 2 + 2 * num_dilations)
    base_w = (jax.random.normal(keys[0], (input_size, channels), jnp.float32)
              / jnp.sqrt(float(input_size)))
    base_b = 0.02 * jax.random.normal(keys[1], (channels,), jnp.float32)
    dw_w, dw_b = [], []
    for i in range(num_dilations):
        dw_w.append(jax.random.normal(keys[2 + 2 * i], (3, 3, channels), jnp.float32) / 3.0)
        dw_b.append(0.02 * jax.random.normal(keys[3 + 2 * i], (channels,), jnp.float32))
    return {"base_w": base_w, "base_b": base_b, "dw_w": dw_w, "dw_b": dw_b}


def reference(x, params, dilation):
    """Plain-JAX reference (same math, XLA convs)."""
    h = jnp.einsum("bhwc,cd->bhwd", x, params["base_w"],
                   preferred_element_type=jnp.float32) + params["base_b"]
    h = _gelu(h)
    C = h.shape[-1]
    outs = []
    for i, d in enumerate(dilation):
        w_hwio = params["dw_w"][i].reshape(3, 3, 1, C)
        h = lax.conv_general_dilated(
            h, w_hwio, window_strides=(1, 1),
            padding=[(d, d), (d, d)], rhs_dilation=(d, d),
            dimension_numbers=("NHWC", "HWIO", "NHWC"),
            feature_group_count=C)
        h = _gelu(h + params["dw_b"][i])
        outs.append(h)
    return jnp.concatenate(outs, axis=-1)


if __name__ == "__main__":
    B, H, W = 2, 8, 8
    input_size, channels = 32, 16
    dilation = (1, 2, 3)

    key = jax.random.PRNGKey(0)
    k_x, k_p = jax.random.split(key)
    x = jax.random.normal(k_x, (B, H, W, input_size), jnp.float32)
    params = init_params(k_p, input_size, channels, len(dilation))

    out = jax.block_until_ready(dilate_conv_layer(x, params, dilation))

    assert out.shape == (B, H, W, channels * len(dilation)), out.shape
    ref = jax.block_until_ready(reference(x, params, dilation))
    assert bool(jnp.all(jnp.isfinite(out)))
    assert bool(jnp.allclose(out, ref, atol=1e-2, rtol=1e-2)), "mismatch vs reference"

    print("KERNEL_OK")
</pallas_src>

<mosaic_0001>
module attributes {stable_mosaic.version = 11 : i64} {
  func.func @kernel(%arg0: i32, %arg1: memref<1x8x8x32xf32, #tpu.memory_space<vmem>>, %arg2: memref<32x16xf32, #tpu.memory_space<vmem>>, %arg3: memref<1x16xf32, #tpu.memory_space<vmem>>, %arg4: memref<3x3x3x16xf32, #tpu.memory_space<vmem>>, %arg5: memref<3x16xf32, #tpu.memory_space<vmem>>, %arg6: memref<1x8x8x48xf32, #tpu.memory_space<vmem>>, %arg7: memref<14x19x16xf32, #tpu.memory_space<vmem>>) attributes {dimension_semantics = [#tpu.dimension_semantics<parallel>], iteration_bounds = array<i64: 2>, scalar_prefetch = 0 : i64, scratch_operands = 1 : i64, tpu.core_type = #tpu.core_type<tc>, window_params = [{transform_indices = @transform_0, window_bounds = array<i64: 1, 8, 8, 32>}, {pipeline_mode = #tpu.pipeline_mode<synchronous>, transform_indices = @transform_1, window_bounds = array<i64: 32, 16>}, {pipeline_mode = #tpu.pipeline_mode<synchronous>, transform_indices = @transform_2, window_bounds = array<i64: 1, 16>}, {pipeline_mode = #tpu.pipeline_mode<synchronous>, transform_indices = @transform_3, window_bounds = array<i64: 3, 3, 3, 16>}, {pipeline_mode = #tpu.pipeline_mode<synchronous>, transform_indices = @transform_4, window_bounds = array<i64: 3, 16>}, {transform_indices = @transform_5, window_bounds = array<i64: 1, 8, 8, 48>}]} {
    %c0 = arith.constant 0 : index
    %c0_0 = arith.constant 0 : index
    %c0_1 = arith.constant 0 : index
    %c0_2 = arith.constant 0 : index
    %0 = vector.load %arg1[%c0, %c0_0, %c0_1, %c0_2] : memref<1x8x8x32xf32, #tpu.memory_space<vmem>>, vector<1x8x8x32xf32>
    %1 = vector.shape_cast %0 : vector<1x8x8x32xf32> to vector<8x8x32xf32>
    %2 = vector.shape_cast %1 : vector<8x8x32xf32> to vector<64x32xf32>
    %c0_3 = arith.constant 0 : index
    %c0_4 = arith.constant 0 : index
    %3 = vector.load %arg2[%c0_3, %c0_4] : memref<32x16xf32, #tpu.memory_space<vmem>>, vector<32x16xf32>
    %cst = arith.constant dense<0.000000e+00> : vector<64x16xf32>
    %4 = tpu.matmul %2, %3, %cst {dimension_numbers = #tpu.dot_dimension_numbers<[1], [0], [0], [1], [0, 0, 1, 1], [], []>} : vector<64x32xf32>, vector<32x16xf32>, vector<64x16xf32> -> vector<64x16xf32>
    %c0_5 = arith.constant 0 : index
    %c0_6 = arith.constant 0 : index
    %5 = vector.load %arg3[%c0_5, %c0_6] : memref<1x16xf32, #tpu.memory_space<vmem>>, vector<1x16xf32>
    %6 = vector.broadcast %5 : vector<1x16xf32> to vector<64x16xf32>
    %7 = arith.addf %4, %6 : vector<64x16xf32>
    %cst_7 = arith.constant 5.000000e-01 : f32
    %8 = vector.broadcast %cst_7 : f32 to vector<64x16xf32>
    %9 = arith.mulf %8, %7 : vector<64x16xf32>
    %cst_8 = arith.constant 0.707106769 : f32
    %10 = vector.broadcast %cst_8 : f32 to vector<64x16xf32>
    %11 = arith.mulf %7, %10 : vector<64x16xf32>
    %12 = math.erf %11 : vector<64x16xf32>
    %cst_9 = arith.constant 1.000000e+00 : f32
    %13 = vector.broadcast %cst_9 : f32 to vector<64x16xf32>
    %14 = arith.addf %13, %12 : vector<64x16xf32>
    %15 = arith.mulf %9, %14 : vector<64x16xf32>
    %16 = vector.shape_cast %15 : vector<64x16xf32> to vector<8x8x16xf32>
    %cst_10 = arith.constant 0.000000e+00 : f32
    %17 = vector.broadcast %cst_10 : f32 to vector<14x19x16xf32>
    %c0_11 = arith.constant 0 : index
    %c0_12 = arith.constant 0 : index
    %c0_13 = arith.constant 0 : index
    %18 = vector.load %arg7[%c0_11, %c0_12, %c0_13] : memref<14x19x16xf32, #tpu.memory_space<vmem>>, vector<14x19x16xf32>
    tpu.vector_store %arg7[%c0_11, %c0_12, %c0_13], %17 {strides = array<i32>} : memref<14x19x16xf32, #tpu.memory_space<vmem>>, vector<14x19x16xf32>,
    %c3 = arith.constant 3 : index
    %c8 = arith.constant 8 : index
    %c0_14 = arith.constant 0 : index
    %19 = vector.load %arg7[%c3, %c8, %c0_14] : memref<14x19x16xf32, #tpu.memory_space<vmem>>, vector<8x8x16xf32>
    tpu.vector_store %arg7[%c3, %c8, %c0_14], %16 {strides = array<i32>} : memref<14x19x16xf32, #tpu.memory_space<vmem>>, vector<8x8x16xf32>,
    %c0_15 = arith.constant 0 : index
    %c0_16 = arith.constant 0 : index
    %c0_17 = arith.constant 0 : index
    %c0_18 = arith.constant 0 : index
    %20 = vector.load %arg4[%c0_15, %c0_16, %c0_17, %c0_18] : memref<3x3x3x16xf32, #tpu.memory_space<vmem>>, vector<1x3x3x16xf32>
    %21 = vector.shape_cast %20 : vector<1x3x3x16xf32> to vector<3x3x16xf32>
    %c0_19 = arith.constant 0 : index
    %c0_20 = arith.constant 0 : index
    %22 = vector.load %arg5[%c0_19, %c0_20] : memref<3x16xf32, #tpu.memory_space<vmem>>, vector<1x16xf32>
    %23 = vector.shape_cast %22 : vector<1x16xf32> to vector<16xf32>
    %cst_21 = arith.constant 0.000000e+00 : f32
    %24 = vector.broadcast %cst_21 : f32 to vector<8x8x16xf32>
    %c2 = arith.constant 2 : index
    %c7 = arith.constant 7 : index
    %c0_22 = arith.constant 0 : index
    %25 = vector.load %arg7[%c2, %c7, %c0_22] : memref<14x19x16xf32, #tpu.memory_space<vmem>>, vector<8x8x16xf32>
    %26 = vector.extract_strided_slice %21 {offsets = [0, 0, 0], sizes = [1, 1, 16], strides = [1, 1, 1]} : vector<3x3x16xf32> to vector<1x1x16xf32>
    %27 = vector.shape_cast %26 : vector<1x1x16xf32> to vector<16xf32>
    %28 = vector.shape_cast %27 : vector<16xf32> to vector<1x1x16xf32>
    %29 = vector.broadcast %28 : vector<1x1x16xf32> to vector<8x8x16xf32>
    %30 = arith.mulf %25, %29 : vector<8x8x16xf32>
    %31 = arith.addf %24, %30 : vector<8x8x16xf32>
    %c2_23 = arith.constant 2 : index
    %c8_24 = arith.constant 8 : index
    %c0_25 = arith.constant 0 : index
    %32 = vector.load %arg7[%c2_23, %c8_24, %c0_25] : memref<14x19x16xf32, #tpu.memory_space<vmem>>, vector<8x8x16xf32>
    %33 = vector.extract_strided_slice %21 {offsets = [0, 1, 0], sizes = [1, 1, 16], strides = [1, 1, 1]} : vector<3x3x16xf32> to vector<1x1x16xf32>
    %34 = vector.shape_cast %33 : vector<1x1x16xf32> to vector<16xf32>
    %35 = vector.shape_cast %34 : vector<16xf32> to vector<1x1x16xf32>
    %36 = vector.broadcast %35 : vector<1x1x16xf32> to vector<8x8x16xf32>
    %37 = arith.mulf %32, %36 : vector<8x8x16xf32>
    %38 = arith.addf %31, %37 : vector<8x8x16xf32>
    %c2_26 = arith.constant 2 : index
    %c9 = arith.constant 9 : index
    %c0_27 = arith.constant 0 : index
    %39 = vector.load %arg7[%c2_26, %c9, %c0_27] : memref<14x19x16xf32, #tpu.memory_space<vmem>>, vector<8x8x16xf32>
    %40 = vector.extract_strided_slice %21 {offsets = [0, 2, 0], sizes = [1, 1, 16], strides = [1, 1, 1]} : vector<3x3x16xf32> to vector<1x1x16xf32>
    %41 = vector.shape_cast %40 : vector<1x1x16xf32> to vector<16xf32>
    %42 = vector.shape_cast %41 : vector<16xf32> to vector<1x1x16xf32>
    %43 = vector.broadcast %42 : vector<1x1x16xf32> to vector<8x8x16xf32>
    %44 = arith.mulf %39, %43 : vector<8x8x16xf32>
    %45 = arith.addf %38, %44 : vector<8x8x16xf32>
    %c3_28 = arith.constant 3 : index
    %c7_29 = arith.constant 7 : index
    %c0_30 = arith.constant 0 : index
    %46 = vector.load %arg7[%c3_28, %c7_29, %c0_30] : memref<14x19x16xf32, #tpu.memory_space<vmem>>, vector<8x8x16xf32>
    %47 = vector.extract_strided_slice %21 {offsets = [1, 0, 0], sizes = [1, 1, 16], strides = [1, 1, 1]} : vector<3x3x16xf32> to vector<1x1x16xf32>
    %48 = vector.shape_cast %47 : vector<1x1x16xf32> to vector<16xf32>
    %49 = vector.shape_cast %48 : vector<16xf32> to vector<1x1x16xf32>
    %50 = vector.broadcast %49 : vector<1x1x16xf32> to vector<8x8x16xf32>
    %51 = arith.mulf %46, %50 : vector<8x8x16xf32>
    %52 = arith.addf %45, %51 : vector<8x8x16xf32>
    %c3_31 = arith.constant 3 : index
    %c8_32 = arith.constant 8 : index
    %c0_33 = arith.constant 0 : index
    %53 = vector.load %arg7[%c3_31, %c8_32, %c0_33] : memref<14x19x16xf32, #tpu.memory_space<vmem>>, vector<8x8x16xf32>
    %54 = vector.extract_strided_slice %21 {offsets = [1, 1, 0], sizes = [1, 1, 16], strides = [1, 1, 1]} : vector<3x3x16xf32> to vector<1x1x16xf32>
    %55 = vector.shape_cast %54 : vector<1x1x16xf32> to vector<16xf32>
    %56 = vector.shape_cast %55 : vector<16xf32> to vector<1x1x16xf32>
    %57 = vector.broadcast %56 : vector<1x1x16xf32> to vector<8x8x16xf32>
    %58 = arith.mulf %53, %57 : vector<8x8x16xf32>
    %59 = arith.addf %52, %58 : vector<8x8x16xf32>
    %c3_34 = arith.constant 3 : index
    %c9_35 = arith.constant 9 : index
    %c0_36 = arith.constant 0 : index
    %60 = vector.load %arg7[%c3_34, %c9_35, %c0_36] : memref<14x19x16xf32, #tpu.memory_space<vmem>>, vector<8x8x16xf32>
    %61 = vector.extract_strided_slice %21 {offsets = [1, 2, 0], sizes = [1, 1, 16], strides = [1, 1, 1]} : vector<3x3x16xf32> to vector<1x1x16xf32>
    %62 = vector.shape_cast %61 : vector<1x1x16xf32> to vector<16xf32>
    %63 = vector.shape_cast %62 : vector<16xf32> to vector<1x1x16xf32>
    %64 = vector.broadcast %63 : vector<1x1x16xf32> to vector<8x8x16xf32>
    %65 = arith.mulf %60, %64 : vector<8x8x16xf32>
    %66 = arith.addf %59, %65 : vector<8x8x16xf32>
    %c4 = arith.constant 4 : index
    %c7_37 = arith.constant 7 : index
    %c0_38 = arith.constant 0 : index
    %67 = vector.load %arg7[%c4, %c7_37, %c0_38] : memref<14x19x16xf32, #tpu.memory_space<vmem>>, vector<8x8x16xf32>
    %68 = vector.extract_strided_slice %21 {offsets = [2, 0, 0], sizes = [1, 1, 16], strides = [1, 1, 1]} : vector<3x3x16xf32> to vector<1x1x16xf32>
    %69 = vector.shape_cast %68 : vector<1x1x16xf32> to vector<16xf32>
    %70 = vector.shape_cast %69 : vector<16xf32> to vector<1x1x16xf32>
    %71 = vector.broadcast %70 : vector<1x1x16xf32> to vector<8x8x16xf32>
    %72 = arith.mulf %67, %71 : vector<8x8x16xf32>
    %73 = arith.addf %66, %72 : vector<8x8x16xf32>
    %c4_39 = arith.constant 4 : index
    %c8_40 = arith.constant 8 : index
    %c0_41 = arith.constant 0 : index
    %74 = vector.load %arg7[%c4_39, %c8_40, %c0_41] : memref<14x19x16xf32, #tpu.memory_space<vmem>>, vector<8x8x16xf32>
    %75 = vector.extract_strided_slice %21 {offsets = [2, 1, 0], sizes = [1, 1, 16], strides = [1, 1, 1]} : vector<3x3x16xf32> to vector<1x1x16xf32>
    %76 = vector.shape_cast %75 : vector<1x1x16xf32> to vector<16xf32>
    %77 = vector.shape_cast %76 : vector<16xf32> to vector<1x1x16xf32>
    %78 = vector.broadcast %77 : vector<1x1x16xf32> to vector<8x8x16xf32>
    %79 = arith.mulf %74, %78 : vector<8x8x16xf32>
    %80 = arith.addf %73, %79 : vector<8x8x16xf32>
    %c4_42 = arith.constant 4 : index
    %c9_43 = arith.constant 9 : index
    %c0_44 = arith.constant 0 : index
    %81 = vector.load %arg7[%c4_42, %c9_43, %c0_44] : memref<14x19x16xf32, #tpu.memory_space<vmem>>, vector<8x8x16xf32>
    %82 = vector.extract_strided_slice %21 {offsets = [2, 2, 0], sizes = [1, 1, 16], strides = [1, 1, 1]} : vector<3x3x16xf32> to vector<1x1x16xf32>
    %83 = vector.shape_cast %82 : vector<1x1x16xf32> to vector<16xf32>
    %84 = vector.shape_cast %83 : vector<16xf32> to vector<1x1x16xf32>
    %85 = vector.broadcast %84 : vector<1x1x16xf32> to vector<8x8x16xf32>
    %86 = arith.mulf %81, %85 : vector<8x8x16xf32>
    %87 = arith.addf %80, %86 : vector<8x8x16xf32>
    %88 = vector.shape_cast %23 : vector<16xf32> to vector<1x1x16xf32>
    %89 = vector.broadcast %88 : vector<1x1x16xf32> to vector<8x8x16xf32>
    %90 = arith.addf %87, %89 : vector<8x8x16xf32>
    %cst_45 = arith.constant 5.000000e-01 : f32
    %91 = vector.broadcast %cst_45 : f32 to vector<8x8x16xf32>
    %92 = arith.mulf %91, %90 : vector<8x8x16xf32>
    %cst_46 = arith.constant 0.707106769 : f32
    %93 = vector.broadcast %cst_46 : f32 to vector<8x8x16xf32>
    %94 = arith.mulf %90, %93 : vector<8x8x16xf32>
    %95 = math.erf %94 : vector<8x8x16xf32>
    %cst_47 = arith.constant 1.000000e+00 : f32
    %96 = vector.broadcast %cst_47 : f32 to vector<8x8x16xf32>
    %97 = arith.addf %96, %95 : vector<8x8x16xf32>
    %98 = arith.mulf %92, %97 : vector<8x8x16xf32>
    %c3_48 = arith.constant 3 : index
    %c8_49 = arith.constant 8 : index
    %c0_50 = arith.constant 0 : index
    %99 = vector.load %arg7[%c3_48, %c8_49, %c0_50] : memref<14x19x16xf32, #tpu.memory_space<vmem>>, vector<8x8x16xf32>
    tpu.vector_store %arg7[%c3_48, %c8_49, %c0_50], %98 {strides = array<i32>} : memref<14x19x16xf32, #tpu.memory_space<vmem>>, vector<8x8x16xf32>,
    %c1 = arith.constant 1 : index
    %c0_51 = arith.constant 0 : index
    %c0_52 = arith.constant 0 : index
    %c0_53 = arith.constant 0 : index
    %100 = vector.load %arg4[%c1, %c0_51, %c0_52, %c0_53] : memref<3x3x3x16xf32, #tpu.memory_space<vmem>>, vector<1x3x3x16xf32>
    %101 = vector.shape_cast %100 : vector<1x3x3x16xf32> to vector<3x3x16xf32>
    %c1_54 = arith.constant 1 : index
    %c0_55 = arith.constant 0 : index
    %102 = vector.load %arg5[%c1_54, %c0_55] : memref<3x16xf32, #tpu.memory_space<vmem>>, vector<1x16xf32>
    %103 = vector.shape_cast %102 : vector<1x16xf32> to vector<16xf32>
    %cst_56 = arith.constant 0.000000e+00 : f32
    %104 = vector.broadcast %cst_56 : f32 to vector<8x8x16xf32>
    %c1_57 = arith.constant 1 : index
    %c6 = arith.constant 6 : index
    %c0_58 = arith.constant 0 : index
    %105 = vector.load %arg7[%c1_57, %c6, %c0_58] : memref<14x19x16xf32, #tpu.memory_space<vmem>>, vector<8x8x16xf32>
    %106 = vector.extract_strided_slice %101 {offsets = [0, 0, 0], sizes = [1, 1, 16], strides = [1, 1, 1]} : vector<3x3x16xf32> to vector<1x1x16xf32>
    %107 = vector.shape_cast %106 : vector<1x1x16xf32> to vector<16xf32>
    %108 = vector.shape_cast %107 : vector<16xf32> to vector<1x1x16xf32>
    %109 = vector.broadcast %108 : vector<1x1x16xf32> to vector<8x8x16xf32>
    %110 = arith.mulf %105, %109 : vector<8x8x16xf32>
    %111 = arith.addf %104, %110 : vector<8x8x16xf32>
    %c1_59 = arith.constant 1 : index
    %c8_60 = arith.constant 8 : index
    %c0_61 = arith.constant 0 : index
    %112 = vector.load %arg7[%c1_59, %c8_60, %c0_61] : memref<14x19x16xf32, #tpu.memory_space<vmem>>, vector<8x8x16xf32>
    %113 = vector.extract_strided_slice %101 {offsets = [0, 1, 0], sizes = [1, 1, 16], strides = [1, 1, 1]} : vector<3x3x16xf32> to vector<1x1x16xf32>
    %114 = vector.shape_cast %113 : vector<1x1x16xf32> to vector<16xf32>
    %115 = vector.shape_cast %114 : vector<16xf32> to vector<1x1x16xf32>
    %116 = vector.broadcast %115 : vector<1x1x16xf32> to vector<8x8x16xf32>
    %117 = arith.mulf %112, %116 : vector<8x8x16xf32>
    %118 = arith.addf %111, %117 : vector<8x8x16xf32>
    %c1_62 = arith.constant 1 : index
    %c10 = arith.constant 10 : index
    %c0_63 = arith.constant 0 : index
    %119 = vector.load %arg7[%c1_62, %c10, %c0_63] : memref<14x19x16xf32, #tpu.memory_space<vmem>>, vector<8x8x16xf32>
    %120 = vector.extract_strided_slice %101 {offsets = [0, 2, 0], sizes = [1, 1, 16], strides = [1, 1, 1]} : vector<3x3x16xf32> to vector<1x1x16xf32>
    %121 = vector.shape_cast %120 : vector<1x1x16xf32> to vector<16xf32>
    %122 = vector.shape_cast %121 : vector<16xf32> to vector<1x1x16xf32>
    %123 = vector.broadcast %122 : vector<1x1x16xf32> to vector<8x8x16xf32>
    %124 = arith.mulf %119, %123 : vector<8x8x16xf32>
    %125 = arith.addf %118, %124 : vector<8x8x16xf32>
    %c3_64 = arith.constant 3 : index
    %c6_65 = arith.constant 6 : index
    %c0_66 = arith.constant 0 : index
    %126 = vector.load %arg7[%c3_64, %c6_65, %c0_66] : memref<14x19x16xf32, #tpu.memory_space<vmem>>, vector<8x8x16xf32>
    %127 = vector.extract_strided_slice %101 {offsets = [1, 0, 0], sizes = [1, 1, 16], strides = [1, 1, 1]} : vector<3x3x16xf32> to vector<1x1x16xf32>
    %128 = vector.shape_cast %127 : vector<1x1x16xf32> to vector<16xf32>
    %129 = vector.shape_cast %128 : vector<16xf32> to vector<1x1x16xf32>
    %130 = vector.broadcast %129 : vector<1x1x16xf32> to vector<8x8x16xf32>
    %131 = arith.mulf %126, %130 : vector<8x8x16xf32>
    %132 = arith.addf %125, %131 : vector<8x8x16xf32>
    %c3_67 = arith.constant 3 : index
    %c8_68 = arith.constant 8 : index
    %c0_69 = arith.constant 0 : index
    %133 = vector.load %arg7[%c3_67, %c8_68, %c0_69] : memref<14x19x16xf32, #tpu.memory_space<vmem>>, vector<8x8x16xf32>
    %134 = vector.extract_strided_slice %101 {offsets = [1, 1, 0], sizes = [1, 1, 16], strides = [1, 1, 1]} : vector<3x3x16xf32> to vector<1x1x16xf32>
    %135 = vector.shape_cast %134 : vector<1x1x16xf32> to vector<16xf32>
    %136 = vector.shape_cast %135 : vector<16xf32> to vector<1x1x16xf32>
    %137 = vector.broadcast %136 : vector<1x1x16xf32> to vector<8x8x16xf32>
    %138 = arith.mulf %133, %137 : vector<8x8x16xf32>
    %139 = arith.addf %132, %138 : vector<8x8x16xf32>
    %c3_70 = arith.constant 3 : index
    %c10_71 = arith.constant 10 : index
    %c0_72 = arith.constant 0 : index
    %140 = vector.load %arg7[%c3_70, %c10_71, %c0_72] : memref<14x19x16xf32, #tpu.memory_space<vmem>>, vector<8x8x16xf32>
    %141 = vector.extract_strided_slice %101 {offsets = [1, 2, 0], sizes = [1, 1, 16], strides = [1, 1, 1]} : vector<3x3x16xf32> to vector<1x1x16xf32>
    %142 = vector.shape_cast %141 : vector<1x1x16xf32> to vector<16xf32>
    %143 = vector.shape_cast %142 : vector<16xf32> to vector<1x1x16xf32>
    %144 = vector.broadcast %143 : vector<1x1x16xf32> to vector<8x8x16xf32>
    %145 = arith.mulf %140, %144 : vector<8x8x16xf32>
    %146 = arith.addf %139, %145 : vector<8x8x16xf32>
    %c5 = arith.constant 5 : index
    %c6_73 = arith.constant 6 : index
    %c0_74 = arith.constant 0 : index
    %147 = vector.load %arg7[%c5, %c6_73, %c0_74] : memref<14x19x16xf32, #tpu.memory_space<vmem>>, vector<8x8x16xf32>
    %148 = vector.extract_strided_slice %101 {offsets = [2, 0, 0], sizes = [1, 1, 16], strides = [1, 1, 1]} : vector<3x3x16xf32> to vector<1x1x16xf32>
    %149 = vector.shape_cast %148 : vector<1x1x16xf32> to vector<16xf32>
    %150 = vector.shape_cast %149 : vector<16xf32> to vector<1x1x16xf32>
    %151 = vector.broadcast %150 : vector<1x1x16xf32> to vector<8x8x16xf32>
    %152 = arith.mulf %147, %151 : vector<8x8x16xf32>
    %153 = arith.addf %146, %152 : vector<8x8x16xf32>
    %c5_75 = arith.constant 5 : index
    %c8_76 = arith.constant 8 : index
    %c0_77 = arith.constant 0 : index
    %154 = vector.load %arg7[%c5_75, %c8_76, %c0_77] : memref<14x19x16xf32, #tpu.memory_space<vmem>>, vector<8x8x16xf32>
    %155 = vector.extract_strided_slice %101 {offsets = [2, 1, 0], sizes = [1, 1, 16], strides = [1, 1, 1]} : vector<3x3x16xf32> to vector<1x1x16xf32>
    %156 = vector.shape_cast %155 : vector<1x1x16xf32> to vector<16xf32>
    %157 = vector.shape_cast %156 : vector<16xf32> to vector<1x1x16xf32>
    %158 = vector.broadcast %157 : vector<1x1x16xf32> to vector<8x8x16xf32>
    %159 = arith.mulf %154, %158 : vector<8x8x16xf32>
    %160 = arith.addf %153, %159 : vector<8x8x16xf32>
    %c5_78 = arith.constant 5 : index
    %c10_79 = arith.constant 10 : index
    %c0_80 = arith.constant 0 : index
    %161 = vector.load %arg7[%c5_78, %c10_79, %c0_80] : memref<14x19x16xf32, #tpu.memory_space<vmem>>, vector<8x8x16xf32>
    %162 = vector.extract_strided_slice %101 {offsets = [2, 2, 0], sizes = [1, 1, 16], strides = [1, 1, 1]} : vector<3x3x16xf32> to vector<1x1x16xf32>
    %163 = vector.shape_cast %162 : vector<1x1x16xf32> to vector<16xf32>
    %164 = vector.shape_cast %163 : vector<16xf32> to vector<1x1x16xf32>
    %165 = vector.broadcast %164 : vector<1x1x16xf32> to vector<8x8x16xf32>
    %166 = arith.mulf %161, %165 : vector<8x8x16xf32>
    %167 = arith.addf %160, %166 : vector<8x8x16xf32>
    %168 = vector.shape_cast %103 : vector<16xf32> to vector<1x1x16xf32>
    %169 = vector.broadcast %168 : vector<1x1x16xf32> to vector<8x8x16xf32>
    %170 = arith.addf %167, %169 : vector<8x8x16xf32>
    %cst_81 = arith.constant 5.000000e-01 : f32
    %171 = vector.broadcast %cst_81 : f32 to vector<8x8x16xf32>
    %172 = arith.mulf %171, %170 : vector<8x8x16xf32>
    %cst_82 = arith.constant 0.707106769 : f32
    %173 = vector.broadcast %cst_82 : f32 to vector<8x8x16xf32>
    %174 = arith.mulf %170, %173 : vector<8x8x16xf32>
    %175 = math.erf %174 : vector<8x8x16xf32>
    %cst_83 = arith.constant 1.000000e+00 : f32
    %176 = vector.broadcast %cst_83 : f32 to vector<8x8x16xf32>
    %177 = arith.addf %176, %175 : vector<8x8x16xf32>
    %178 = arith.mulf %172, %177 : vector<8x8x16xf32>
    %c3_84 = arith.constant 3 : index
    %c8_85 = arith.constant 8 : index
    %c0_86 = arith.constant 0 : index
    %179 = vector.load %arg7[%c3_84, %c8_85, %c0_86] : memref<14x19x16xf32, #tpu.memory_space<vmem>>, vector<8x8x16xf32>
    tpu.vector_store %arg7[%c3_84, %c8_85, %c0_86], %178 {strides = array<i32>} : memref<14x19x16xf32, #tpu.memory_space<vmem>>, vector<8x8x16xf32>,
    %c2_87 = arith.constant 2 : index
    %c0_88 = arith.constant 0 : index
    %c0_89 = arith.constant 0 : index
    %c0_90 = arith.constant 0 : index
    %180 = vector.load %arg4[%c2_87, %c0_88, %c0_89, %c0_90] : memref<3x3x3x16xf32, #tpu.memory_space<vmem>>, vector<1x3x3x16xf32>
    %181 = vector.shape_cast %180 : vector<1x3x3x16xf32> to vector<3x3x16xf32>
    %c2_91 = arith.constant 2 : index
    %c0_92 = arith.constant 0 : index
    %182 = vector.load %arg5[%c2_91, %c0_92] : memref<3x16xf32, #tpu.memory_space<vmem>>, vector<1x16xf32>
    %183 = vector.shape_cast %182 : vector<1x16xf32> to vector<16xf32>
    %cst_93 = arith.constant 0.000000e+00 : f32
    %184 = vector.broadcast %cst_93 : f32 to vector<8x8x16xf32>
    %c0_94 = arith.constant 0 : index
    %c5_95 = arith.constant 5 : index
    %c0_96 = arith.constant 0 : index
    %185 = vector.load %arg7[%c0_94, %c5_95, %c0_96] : memref<14x19x16xf32, #tpu.memory_space<vmem>>, vector<8x8x16xf32>
    %186 = vector.extract_strided_slice %181 {offsets = [0, 0, 0], sizes = [1, 1, 16], strides = [1, 1, 1]} : vector<3x3x16xf32> to vector<1x1x16xf32>
    %187 = vector.shape_cast %186 : vector<1x1x16xf32> to vector<16xf32>
    %188 = vector.shape_cast %187 : vector<16xf32> to vector<1x1x16xf32>
    %189 = vector.broadcast %188 : vector<1x1x16xf32> to vector<8x8x16xf32>
    %190 = arith.mulf %185, %189 : vector<8x8x16xf32>
    %191 = arith.addf %184, %190 : vector<8x8x16xf32>
    %c0_97 = arith.constant 0 : index
    %c8_98 = arith.constant 8 : index
    %c0_99 = arith.constant 0 : index
    %192 = vector.load %arg7[%c0_97, %c8_98, %c0_99] : memref<14x19x16xf32, #tpu.memory_space<vmem>>, vector<8x8x16xf32>
    %193 = vector.extract_strided_slice %181 {offsets = [0, 1, 0], sizes = [1, 1, 16], strides = [1, 1, 1]} : vector<3x3x16xf32> to vector<1x1x16xf32>
    %194 = vector.shape_cast %193 : vector<1x1x16xf32> to vector<16xf32>
    %195 = vector.shape_cast %194 : vector<16xf32> to vector<1x1x16xf32>
    %196 = vector.broadcast %195 : vector<1x1x16xf32> to vector<8x8x16xf32>
    %197 = arith.mulf %192, %196 : vector<8x8x16xf32>
    %198 = arith.addf %191, %197 : vector<8x8x16xf32>
    %c0_100 = arith.constant 0 : index
    %c11 = arith.constant 11 : index
    %c0_101 = arith.constant 0 : index
    %199 = vector.load %arg7[%c0_100, %c11, %c0_101] : memref<14x19x16xf32, #tpu.memory_space<vmem>>, vector<8x8x16xf32>
    %200 = vector.extract_strided_slice %181 {offsets = [0, 2, 0], sizes = [1, 1, 16], strides = [1, 1, 1]} : vector<3x3x16xf32> to vector<1x1x16xf32>
    %201 = vector.shape_cast %200 : vector<1x1x16xf32> to vector<16xf32>
    %202 = vector.shape_cast %201 : vector<16xf32> to vector<1x1x16xf32>
    %203 = vector.broadcast %202 : vector<1x1x16xf32> to vector<8x8x16xf32>
    %204 = arith.mulf %199, %203 : vector<8x8x16xf32>
    %205 = arith.addf %198, %204 : vector<8x8x16xf32>
    %c3_102 = arith.constant 3 : index
    %c5_103 = arith.constant 5 : index
    %c0_104 = arith.constant 0 : index
    %206 = vector.load %arg7[%c3_102, %c5_103, %c0_104] : memref<14x19x16xf32, #tpu.memory_space<vmem>>, vector<8x8x16xf32>
    %207 = vector.extract_strided_slice %181 {offsets = [1, 0, 0], sizes = [1, 1, 16], strides = [1, 1, 1]} : vector<3x3x16xf32> to vector<1x1x16xf32>
    %208 = vector.shape_cast %207 : vector<1x1x16xf32> to vector<16xf32>
    %209 = vector.shape_cast %208 : vector<16xf32> to vector<1x1x16xf32>
    %210 = vector.broadcast %209 : vector<1x1x16xf32> to vector<8x8x16xf32>
    %211 = arith.mulf %206, %210 : vector<8x8x16xf32>
    %212 = arith.addf %205, %211 : vector<8x8x16xf32>
    %c3_105 = arith.constant 3 : index
    %c8_106 = arith.constant 8 : index
    %c0_107 = arith.constant 0 : index
    %213 = vector.load %arg7[%c3_105, %c8_106, %c0_107] : memref<14x19x16xf32, #tpu.memory_space<vmem>>, vector<8x8x16xf32>
    %214 = vector.extract_strided_slice %181 {offsets = [1, 1, 0], sizes = [1, 1, 16], strides = [1, 1, 1]} : vector<3x3x16xf32> to vector<1x1x16xf32>
    %215 = vector.shape_cast %214 : vector<1x1x16xf32> to vector<16xf32>
    %216 = vector.shape_cast %215 : vector<16xf32> to vector<1x1x16xf32>
    %217 = vector.broadcast %216 : vector<1x1x16xf32> to vector<8x8x16xf32>
    %218 = arith.mulf %213, %217 : vector<8x8x16xf32>
    %219 = arith.addf %212, %218 : vector<8x8x16xf32>
    %c3_108 = arith.constant 3 : index
    %c11_109 = arith.constant 11 : index
    %c0_110 = arith.constant 0 : index
    %220 = vector.load %arg7[%c3_108, %c11_109, %c0_110] : memref<14x19x16xf32, #tpu.memory_space<vmem>>, vector<8x8x16xf32>
    %221 = vector.extract_strided_slice %181 {offsets = [1, 2, 0], sizes = [1, 1, 16], strides = [1, 1, 1]} : vector<3x3x16xf32> to vector<1x1x16xf32>
    %222 = vector.shape_cast %221 : vector<1x1x16xf32> to vector<16xf32>
    %223 = vector.shape_cast %222 : vector<16xf32> to vector<1x1x16xf32>
    %224 = vector.broadcast %223 : vector<1x1x16xf32> to vector<8x8x16xf32>
    %225 = arith.mulf %220, %224 : vector<8x8x16xf32>
    %226 = arith.addf %219, %225 : vector<8x8x16xf32>
    %c6_111 = arith.constant 6 : index
    %c5_112 = arith.constant 5 : index
    %c0_113 = arith.constant 0 : index
    %227 = vector.load %arg7[%c6_111, %c5_112, %c0_113] : memref<14x19x16xf32, #tpu.memory_space<vmem>>, vector<8x8x16xf32>
    %228 = vector.extract_strided_slice %181 {offsets = [2, 0, 0], sizes = [1, 1, 16], strides = [1, 1, 1]} : vector<3x3x16xf32> to vector<1x1x16xf32>
    %229 = vector.shape_cast %228 : vector<1x1x16xf32> to vector<16xf32>
    %230 = vector.shape_cast %229 : vector<16xf32> to vector<1x1x16xf32>
    %231 = vector.broadcast %230 : vector<1x1x16xf32> to vector<8x8x16xf32>
    %232 = arith.mulf %227, %231 : vector<8x8x16xf32>
    %233 = arith.addf %226, %232 : vector<8x8x16xf32>
    %c6_114 = arith.constant 6 : index
    %c8_115 = arith.constant 8 : index
    %c0_116 = arith.constant 0 : index
    %234 = vector.load %arg7[%c6_114, %c8_115, %c0_116] : memref<14x19x16xf32, #tpu.memory_space<vmem>>, vector<8x8x16xf32>
    %235 = vector.extract_strided_slice %181 {offsets = [2, 1, 0], sizes = [1, 1, 16], strides = [1, 1, 1]} : vector<3x3x16xf32> to vector<1x1x16xf32>
    %236 = vector.shape_cast %235 : vector<1x1x16xf32> to vector<16xf32>
    %237 = vector.shape_cast %236 : vector<16xf32> to vector<1x1x16xf32>
    %238 = vector.broadcast %237 : vector<1x1x16xf32> to vector<8x8x16xf32>
    %239 = arith.mulf %234, %238 : vector<8x8x16xf32>
    %240 = arith.addf %233, %239 : vector<8x8x16xf32>
    %c6_117 = arith.constant 6 : index
    %c11_118 = arith.constant 11 : index
    %c0_119 = arith.constant 0 : index
    %241 = vector.load %arg7[%c6_117, %c11_118, %c0_119] : memref<14x19x16xf32, #tpu.memory_space<vmem>>, vector<8x8x16xf32>
    %242 = vector.extract_strided_slice %181 {offsets = [2, 2, 0], sizes = [1, 1, 16], strides = [1, 1, 1]} : vector<3x3x16xf32> to vector<1x1x16xf32>
    %243 = vector.shape_cast %242 : vector<1x1x16xf32> to vector<16xf32>
    %244 = vector.shape_cast %243 : vector<16xf32> to vector<1x1x16xf32>
    %245 = vector.broadcast %244 : vector<1x1x16xf32> to vector<8x8x16xf32>
    %246 = arith.mulf %241, %245 : vector<8x8x16xf32>
    %247 = arith.addf %240, %246 : vector<8x8x16xf32>
    %248 = vector.shape_cast %183 : vector<16xf32> to vector<1x1x16xf32>
    %249 = vector.broadcast %248 : vector<1x1x16xf32> to vector<8x8x16xf32>
    %250 = arith.addf %247, %249 : vector<8x8x16xf32>
    %cst_120 = arith.constant 5.000000e-01 : f32
    %251 = vector.broadcast %cst_120 : f32 to vector<8x8x16xf32>
    %252 = arith.mulf %251, %250 : vector<8x8x16xf32>
    %cst_121 = arith.constant 0.707106769 : f32
    %253 = vector.broadcast %cst_121 : f32 to vector<8x8x16xf32>
    %254 = arith.mulf %250, %253 : vector<8x8x16xf32>
    %255 = math.erf %254 : vector<8x8x16xf32>
    %cst_122 = arith.constant 1.000000e+00 : f32
    %256 = vector.broadcast %cst_122 : f32 to vector<8x8x16xf32>
    %257 = arith.addf %256, %255 : vector<8x8x16xf32>
    %258 = arith.mulf %252, %257 : vector<8x8x16xf32>
    %259 = tpu.concatenate %98, %178, %258 in 2 : vector<8x8x16xf32>, vector<8x8x16xf32>, vector<8x8x16xf32> -> vector<8x8x48xf32>
    %c0_123 = arith.constant 0 : index
    %c0_124 = arith.constant 0 : index
    %c0_125 = arith.constant 0 : index
    %c0_126 = arith.constant 0 : index
    %260 = vector.load %arg6[%c0_123, %c0_124, %c0_125, %c0_126] : memref<1x8x8x48xf32, #tpu.memory_space<vmem>>, vector<1x8x8x48xf32>
    %261 = vector.shape_cast %260 : vector<1x8x8x48xf32> to vector<8x8x48xf32>
    %262 = vector.shape_cast %259 : vector<8x8x48xf32> to vector<1x8x8x48xf32>
    tpu.vector_store %arg6[%c0_123, %c0_124, %c0_125, %c0_126], %262 {strides = array<i32>} : memref<1x8x8x48xf32, #tpu.memory_space<vmem>>, vector<1x8x8x48xf32>,
    return
  }
  func.func @transform_0(%arg0: i32) -> (i32, i32, i32, i32) {
    %c0_i32 = arith.constant 0 : i32
    %c0_i32_0 = arith.constant 0 : i32
    %c0_i32_1 = arith.constant 0 : i32
    %c0_i32_2 = arith.constant 0 : i32
    return %arg0, %c0_i32, %c0_i32_0, %c0_i32_1 : i32, i32, i32, i32
  }
  func.func @transform_1(%arg0: i32) -> (i32, i32) {
    %c0_i32 = arith.constant 0 : i32
    %c0_i32_0 = arith.constant 0 : i32
    %c0_i32_1 = arith.constant 0 : i32
    return %c0_i32, %c0_i32_0 : i32, i32
  }
  func.func @transform_2(%arg0: i32) -> (i32, i32) {
    %c0_i32 = arith.constant 0 : i32
    %c0_i32_0 = arith.constant 0 : i32
    %c0_i32_1 = arith.constant 0 : i32
    return %c0_i32, %c0_i32_0 : i32, i32
  }
  func.func @transform_3(%arg0: i32) -> (i32, i32, i32, i32) {
    %c0_i32 = arith.constant 0 : i32
    %c0_i32_0 = arith.constant 0 : i32
    %c0_i32_1 = arith.constant 0 : i32
    %c0_i32_2 = arith.constant 0 : i32
    %c0_i32_3 = arith.constant 0 : i32
    return %c0_i32, %c0_i32_0, %c0_i32_1, %c0_i32_2 : i32, i32, i32, i32
  }
  func.func @transform_4(%arg0: i32) -> (i32, i32) {
    %c0_i32 = arith.constant 0 : i32
    %c0_i32_0 = arith.constant 0 : i32
    %c0_i32_1 = arith.constant 0 : i32
    return %c0_i32, %c0_i32_0 : i32, i32
  }
  func.func @transform_5(%arg0: i32) -> (i32, i32, i32, i32) {
    %c0_i32 = arith.constant 0 : i32
    %c0_i32_0 = arith.constant 0 : i32
    %c0_i32_1 = arith.constant 0 : i32
    %c0_i32_2 = arith.constant 0 : i32
    return %arg0, %c0_i32, %c0_i32_0, %c0_i32_1 : i32, i32, i32, i32
  }
}

</mosaic_0001>

<bundles_post_ra>
// kernel: tpu_custom_call.1
= control target key start
LH: loop header
LB: loop body
LE: loop exit
PB: predicated region body
PF: predicated region fallthrough
CT: control target
= control target key end

     0   :  { %10 = vsyncpa [#allocation4], 0  ;;  %s2898_s0 = inlined_call_operand.hbm [shape: f32[2,8,8,32], index: 0, kind: input, shape index: {}]   ;;  %s2899_s1 = inlined_call_operand.vmem [shape: f32[32,16], index: 1, kind: input, shape index: {}]   ;;  %s2900_s2 = inlined_call_operand.vmem [shape: f32[1,16], index: 2, kind: input, shape index: {}]   ;;  %s2901_s3 = inlined_call_operand.vmem [shape: f32[3,3,3,16], index: 3, kind: input, shape index: {}]   ;;  %s2902_s4 = inlined_call_operand.vmem [shape: f32[3,16], index: 4, kind: input, shape index: {}]   ;;  %s2903_s5 = inlined_call_operand.hbm [shape: f32[2,8,8,48], index: 5, kind: output, shape index: {}]  }
   0x1   :  { %12 = vsyncpa [#allocation4 + $0x1], 0 }
   0x2   :  { %13 = vsyncpa [#allocation5], 0 }
   0x3   :  { %15 = vsyncpa [#allocation5 + $0x1], 0  ;;  %s1941_s18 = smov 0   ;;  %s1943_s19 = smov 0  }
   0x4   :  { %s1945_s20 = smov 0   ;;  %s1947_s21 = smov 0  }
   0x5 LB: > { %s1962_s22 = sadd.s32 4294967295, %s1900_s21   ;;  %s1608_s23 = sadd.s32 4294967294, %s1900_s21   ;;  %s1900_s21 = sphi %s1947_s21, %s2957_s21   ;;  %s1896_s20 = sphi %s1945_s20, %s2956_s20   ;;  %s1892_s19 = sphi %s1943_s19, %s2955_s19   ;;  %s1888_s18 = sphi %s1941_s18, %s2954_s18  }
   0x6   : > { %s1966_s24 = sadd.s32 1, %s1900_s21   ;;  %s28_s25 = sadd.s32 1, %s1896_s20 }
   0x7   : > { %s25_s26 = ssub.s32 %s1900_s21, %s1966_s24  ;;  %p35_p0 = scmp.ne.s32.totalorder %s1896_s20, %s1892_s19 }
   0x8   : > { %p26_p1 = scmp.eq.s32.totalorder %s25_s26, 0  ;;  %p36_p2 = scmp.eq.s32.totalorder %s1900_s21, 0 }
   0x9   : > { %p41_p3 = scmp.ne.s32.totalorder %s1892_s19, %s1888_s18  ;;  %p42_p4 = scmp.eq.s32.totalorder %s1962_s22, 0 }
   0xa   : > { %s1978_s27 = scalar_select %p26_p1, %s1896_s20, %s28_s25  }
   0xb   : > { %p1980_p5 = por %p36_p2, %p35_p0  ;;  %p1984_p6 = por %p42_p4, %p41_p3 }
   0xc   : > { %p149_p7 = scmp.eq.s32.totalorder %s1962_s22, 1  ;;  %p155_p8 = scmp.eq.s32.totalorder %s1608_s23, 1 }
   0xd   : > { %p1698_p10 = scmp.lt.s32.totalorder %s1900_s21, 2  ;;  %s187_s7 = sand.u32 1, %s1896_s20  }
   0xe   : > { %p1991_p11 = por %p149_p7, %p35_p0  ;;  %p1995_p12 = por %p155_p8, %p41_p3 }
   0xf   : > { %s1640_s8 = sshll.u32 %s1900_s21, 10  ;;  %s1611_s9 = sshll.u32 %s187_s7, 6 }
  0x10   : > { %s2922_s30 = scalar_select %p1991_p11, 1, 0 }
  0x11   : > { %s2923_s6 = scalar_select %p1995_p12, 1, 0 }
  0x12   : > { %s2004_s12 = scalar_lea.hbm %s2898_s0, %s1640_s8  ;;  %s191_s13 = scalar_lea.vmem [#allocation3], %s1611_s9 }
  0x13   : > { %s198_s14 = sshll.u32 %s191_s13, 4  ;;  %p2008_p13 = pnand %p1698_p10, %p1980_p5  ;;  %s2012_s14 = int_to_ptr.vmem [resolvable:$true] %s198_s14 }
  0x14   : > { %s2014_s16 = scalar_lea.sflag [#allocation4], %s187_s7  ;;  %s1804_s17 = scalar_lea.hbm %s2004_s12, 1024 }
  0x15   : > { %p1805_p0 = scmp.ne.s32.totalorder %s2004_s12, %s1804_s17  ;;  %p1806_p1 = pneg %p2008_p13 }
  0x16   : > { %s1809_s26 = scalar_lea.hbm %s2898_s0, 2048  ;;  %p1810_p4 = scmp.lt.u32.totalorder %s2004_s12, %s2898_s0 }
  0x17   : > { %p1807_p2 = pnand %p1806_p1, %p1805_p0  ;;  %p1811_p5 = scmp.lt.u32.totalorder %s1809_s26, %s1804_s17 }
  0x18   : > { %p1813_p8 = scmp.lt.u32.totalorder %s1804_s17, %s2004_s12 }
  0x19   : > { %p1808_p3 = pneg %p1807_p2  ;;  %p1812_p7 = por %p1811_p5, %p1810_p4 }
  0x1b   : > { %p1814_p10 = por %p1813_p8, %p1812_p7 }
  0x1d   : > { %p1815_p9 = pnand %p1814_p10, %p1808_p3 }
  0x1f   : > { %1818 = shalt.err (!%p1815_p9)
}
  0x20   : > { %s1819_s7 = scalar_lea.vmem %s2012_s14, 1024  ;;  %s1902_s9 = smov [#allocation3]  }
  0x21   : > { %p1820_p0 = scmp.ne.s32.totalorder %s2012_s14, %s1819_s7  ;;  %s1824_s10 = sshll.u32 %s1902_s9, 4  ;;  %s1825_s10 = int_to_ptr.vmem [resolvable:$false] %s1824_s10 }
  0x22   : > { %s1826_s11 = scalar_lea.vmem %s1825_s10, 2048  ;;  %p1827_p11 = scmp.lt.s32.totalorder %s2012_s14, %s1825_s10 }
  0x23   : > { %p1822_p2 = pnand %p1820_p0, %p1806_p1  ;;  %p1828_p4 = scmp.lt.s32.totalorder %s1826_s11, %s1819_s7 }
  0x25   : > { %p1823_p12 = pneg %p1822_p2  ;;  %p1829_p5 = por %p1828_p4, %p1827_p11 }
  0x27   : > { %p1830_p7 = pnand %p1829_p5, %p1823_p12 }
  0x29   : > { %1833 = shalt.err (!%p1830_p7)
}
  0x2a   : > { %s1903_s13 = smov 128   ;;  %s1904_s17 = smov 8  }
  0x2b   : > { %1693 = dma.hbm_to_vmem [thread:$0]  (!%p2008_p13), %s2004_s12, 1024, %s2012_s14, %s2014_s16, %s1903_s13, %s1903_s13, %s1904_s17  }
  0x2c   : > { %p1614_p9 = scmp.ge.s32.totalorder %s1900_s21, 1  ;;  %p206_p1 = scmp.lt.s32.totalorder %s1900_s21, 3 }
  0x2e   : > { %p207_p3 = pnand %p1614_p9, %p206_p1 }
  0x30   : > { %210 = sbr.rel (%p207_p3) target bundleno = 605 (0x25d), region = 40 }
  0x37   : > { %s2045_s23 = sand.u32 1, %s1892_s19  }
  0x38   : > { %s1615_s25 = sshll.u32 %s2045_s23, 6  ;;  %s213_s26 = scalar_lea.sflag [#allocation4], %s2045_s23 }
  0x39   : > { %s2051_s28 = scalar_lea.vmem [#allocation3], %s1615_s25 }
  0x3a   : > { %1879 = dma.done.wait (%p1984_p6), %s213_s26, 1024  }
  0x3b   : > { %1881 = vsyncadd (%p1984_p6), %s213_s26, 4294966272  ;;  %vm262_vm0 = vcmask 261120   ;;  %v251_v0 = vld [vmem:[%s2899_s1] sm:$0xff]  ;;  %v252_v1 = vld [vmem:[%s2899_s1 + $0x8] sm:$0xff]  ;;  %vm432_vm1 = vcmask 130048   ;;  %v1905_v14 = vmov 0.0   ;;  %v498_v22 = vlaneseq }
  0x3c   : > { %v253_v2 = vld [vmem:[%s2899_s1 + $0x10] sm:$0xff]  ;;  %v1674_v3 = vpack.c.bf16 %v252_v1, %v251_v0  ;;  %v254_v4 = vld [vmem:[%s2899_s1 + $0x18] sm:$0xff]  ;;  %v245_v10 = vld [vmem:[%s2051_s28 + $0x10] sm:$0xff]  ;;  %446 = vst.msk [vmem:[#allocation2 + $0x60] sm:$0xff] %vm432_vm1, %v1905_v14  ;;  %vm435_vm2 = vcmask 124928   ;;  %s1906_s15 = smov 16  }
  0x3d   : > { %v243_v5 = vld [vmem:[%s2051_s28] sm:$0xff]  ;;  %v1678_v7 = vpack.c.bf16 %v254_v4, %v253_v2  ;;  %v244_v8 = vld [vmem:[%s2051_s28 + $0x8] sm:$0xff]  ;;  %v249_v11 = vld [vmem:[%s2051_s28 + $0x30] sm:$0xff]  ;;  %447 = vst.msk [vmem:[#allocation2 + $0x68] sm:$0xff] %vm432_vm1, %v1905_v14  ;;  %v499_v31 = vshrl.u32 %v498_v22, 7  ;;  %s1907_s29 = smov 32  }
  0x3e   : > { %v247_v6 = vld [vmem:[%s2051_s28 + $0x20] sm:$0xff]  ;;  %1662 = vmatprep.mubr.msk.f32.mxu0 %vm262_vm0, %v243_v5  ;;  %1675 = vmatprep.subr.bf16.mxu0 %v1674_v3  ;;  %v248_v9 = vld [vmem:[%s2051_s28 + $0x28] sm:$0xff]  ;;  %v246_v12 = vld [vmem:[%s2051_s28 + $0x18] sm:$0xff]  ;;  %433 = vst.msk [vmem:[#allocation2] sm:$0xff] %vm432_vm1, %v1905_v14  ;;  %vm1512_vm3 = vcmask 392192   ;;  %s242_s10 = scalar_lea.vmem [#allocation6], %s1615_s25 }
  0x3f   : > { %1668 = vmatprep.mubr.msk.f32.mxu1 %vm262_vm0, %v247_v6  ;;  %1682 = vmatprep.subr.bf16.mxu1 %v1674_v3  ;;  %v250_v13 = vld [vmem:[%s2051_s28 + $0x38] sm:$0xff]  ;;  %434 = vst.msk [vmem:[#allocation2 + $0x8] sm:$0xff] %vm432_vm1, %v1905_v14  ;;  %437 = vst.msk [vmem:[#allocation2 + $0x18] sm:$0xff] %vm432_vm1, %v1905_v14  ;;  %v1617_v15 = vld [vmem:[%s2900_s2] ss:$0 sm:$0xff]  ;;  %v2116_v41 = vsub.s32 0, %v499_v31 }
  0x40   : > { %1677 = vmatpush3.bf16.msra.mxu0 %v1674_v3  ;;  %1684 = vmatpush3.bf16.msra.mxu1 %v1674_v3  ;;  %438 = vst.msk [vmem:[#allocation2 + $0x20] sm:$0xff] %vm432_vm1, %v1905_v14  ;;  %440 = vst.msk [vmem:[#allocation2 + $0x30] sm:$0xff] %vm432_vm1, %v1905_v14  ;;  %v485_v43 = vld [vmem:[%s2901_s3] sm:$0x7]  ;;  %v2121_v44 = vsub.s32 1, %v499_v31  ;;  %v2129_v52 = vsub.s32 2, %v499_v31 }
  0x41   : > { %1679 = vmatprep.subr.bf16.mxu0 %v1678_v7  ;;  %1683 = vmatprep.subr.bf16.mxu1 %v1678_v7  ;;  %441 = vst.msk [vmem:[#allocation2 + $0x38] sm:$0xff] %vm432_vm1, %v1905_v14  ;;  %443 = vst.msk [vmem:[#allocation2 + $0x48] sm:$0xff] %vm432_vm1, %v1905_v14  ;;  %v2124_v45 = vrot.slane %v485_v43, %v2116_v41  ;;  %s1535_s25 = sshll.u32 %s242_s10, 4  ;;  %s1641_s11 = sshll.u32 %s1962_s22, 10  ;;  %s2842_s25 = int_to_ptr.vmem [resolvable:$true] %s1535_s25 }
  0x42   : > { %444 = vst.msk [vmem:[#allocation2 + $0x50] sm:$0xff] %vm432_vm1, %v1905_v14  ;;  %449 = vst.msk [vmem:[#allocation2 + $0x78] sm:$0xff] %vm432_vm1, %v1905_v14  ;;  %v2127_v47 = vrot.slane %v485_v43, %v2121_v44  ;;  %v2138_v3 = vrot.slane %v485_v43, %v2129_v52  ;;  %s2850_s17 = scalar_lea.hbm %s2903_s5, %s1641_s11  ;;  %s1522_s26 = scalar_lea.sflag [#allocation5], %s2045_s23 }
  0x43   : > { %450 = vst.msk [vmem:[#allocation2 + $0x80] sm:$0xff] %vm432_vm1, %v1905_v14  ;;  %452 = vst.msk [vmem:[#allocation2 + $0x90] sm:$0xff] %vm432_vm1, %v1905_v14  ;;  %s1834_s28 = scalar_lea.vmem %s2842_s25, 1024  ;;  %p2951_p11 = scmp.ne.s32.totalorder %s2922_s30, 0 }
  0x44   : > { %1681 = vmatpush3.bf16.msra.mxu0 %v1678_v7  ;;  %1685 = vmatpush3.bf16.msra.mxu1 %v1678_v7  ;;  %453 = vst.msk [vmem:[#allocation2 + $0x98] sm:$0xff] %vm432_vm1, %v1905_v14  ;;  %455 = vst.msk [vmem:[#allocation2 + $0xa8] sm:$0xff] %vm432_vm1, %v1905_v14  ;;  %p1835_p6 = scmp.ne.s32.totalorder %s2842_s25, %s1834_s28  ;;  %s1908_s12 = smov [#allocation6]  }
  0x45   : > { %456 = vst.msk [vmem:[#allocation2 + $0xb0] sm:$0xff] %vm432_vm1, %v1905_v14  ;;  %458 = vst.msk [vmem:[#allocation2 + $0xc0] sm:$0xff] %vm432_vm1, %v1905_v14  ;;  %s1838_s14 = sshll.u32 %s1908_s12, 4  ;;  %s1839_s14 = int_to_ptr.vmem [resolvable:$false] %s1838_s14 }
  0x46   : > { %459 = vst.msk [vmem:[#allocation2 + $0xc8] sm:$0xff] %vm432_vm1, %v1905_v14  ;;  %461 = vst.msk [vmem:[#allocation2 + $0xd8] sm:$0xff] %vm432_vm1, %v1905_v14  ;;  %p1836_p12 = pnand %p1835_p6, %p2951_p11  ;;  %p1841_p8 = scmp.lt.s32.totalorder %s2842_s25, %s1839_s14 }
  0x47   : > { %1663 = vmatmul.mubr.msk.f32.vlgmr.msra.gmra.mrb[0].mxu0 %vm262_vm0, %v244_v8  ;;  %1669 = vmatmul.mubr.msk.f32.vlgmr.msra.gmra.mrb[0].mxu1 %vm262_vm0, %v248_v9  ;;  %462 = vst.msk [vmem:[#allocation2 + $0xe0] sm:$0xff] %vm432_vm1, %v1905_v14  ;;  %464 = vst.msk [vmem:[#allocation2 + $0xf0] sm:$0xff] %vm432_vm1, %v1905_v14 }
  0x48   : > { %1665 = vmatprep.mubr.msk.f32.mxu0 %vm262_vm0, %v245_v10  ;;  %1671 = vmatprep.mubr.msk.f32.mxu1 %vm262_vm0, %v249_v11  ;;  %465 = vst.msk [vmem:[#allocation2 + $0xf8] sm:$0xff] %vm432_vm1, %v1905_v14  ;;  %467 = vst.msk [vmem:[#allocation2 + $0x108] sm:$0xff] %vm432_vm1, %v1905_v14  ;;  %v490_v48 = vld [vmem:[#allocation2 + $0x37] sm:$0xff]  ;;  %p1837_p13 = pneg %p1836_p12 }
  0x49   : > { %468 = vst.msk [vmem:[#allocation2 + $0x110] sm:$0xff] %vm432_vm1, %v1905_v14  ;;  %470 = vst.msk [vmem:[#allocation2 + $0x120] sm:$0xff] %vm432_vm1, %v1905_v14  ;;  %v2131_v53 = vld [vmem:[#allocation2 + $0x38] sm:$0xff]  ;;  %v502_v61 = vmul.f32 %v2124_v45, %v490_v48 }
  0x4a   : > { %471 = vst.msk [vmem:[#allocation2 + $0x128] sm:$0xff] %vm432_vm1, %v1905_v14  ;;  %473 = vst.msk [vmem:[#allocation2 + $0x138] sm:$0xff] %vm432_vm1, %v1905_v14  ;;  %v530_v63 = vmul.f32 %v2127_v47, %v2131_v53 }
  0x4b   : > { %1666 = vmatmul.mubr.msk.f32.gmra.mrb[2].mxu0 %vm262_vm0, %v246_v12  ;;  %1672 = vmatmul.mubr.msk.f32.gmra.mrb[2].mxu1 %vm262_vm0, %v250_v13  ;;  %474 = vst.msk [vmem:[#allocation2 + $0x140] sm:$0xff] %vm432_vm1, %v1905_v14  ;;  %2925 = vst [vmem:[#allocation9_spill] sm:$0xff] %v2121_v44 }
  0x4c   : > { %448 = vst.msk [vmem:[#allocation2 + $0x70] sm:$0x7] %vm435_vm2, %v1905_v14  ;;  %436 = vst.msk [vmem:[#allocation2 + $0x10] sm:$0x7] %vm435_vm2, %v1905_v14 }
  0x4d   : > { %439 = vst.msk [vmem:[#allocation2 + $0x28] sm:$0x7] %vm435_vm2, %v1905_v14  ;;  %442 = vst.msk [vmem:[#allocation2 + $0x40] sm:$0x7] %vm435_vm2, %v1905_v14 }
  0x4e   : > { %445 = vst.msk [vmem:[#allocation2 + $0x58] sm:$0x7] %vm435_vm2, %v1905_v14  ;;  %451 = vst.msk [vmem:[#allocation2 + $0x88] sm:$0x7] %vm435_vm2, %v1905_v14 }
  0x4f   : > { %454 = vst.msk [vmem:[#allocation2 + $0xa0] sm:$0x7] %vm435_vm2, %v1905_v14  ;;  %457 = vst.msk [vmem:[#allocation2 + $0xb8] sm:$0x7] %vm435_vm2, %v1905_v14 }
  0x50   : > { %460 = vst.msk [vmem:[#allocation2 + $0xd0] sm:$0x7] %vm435_vm2, %v1905_v14  ;;  %463 = vst.msk [vmem:[#allocation2 + $0xe8] sm:$0x7] %vm435_vm2, %v1905_v14 }
  0x51   : > { %466 = vst.msk [vmem:[#allocation2 + $0x100] sm:$0x7] %vm435_vm2, %v1905_v14  ;;  %469 = vst.msk [vmem:[#allocation2 + $0x118] sm:$0x7] %vm435_vm2, %v1905_v14 }
  0x52   : > { %472 = vst.msk [vmem:[#allocation2 + $0x130] sm:$0x7] %vm435_vm2, %v1905_v14  ;;  %475 = vst.msk [vmem:[#allocation2 + $0x148] sm:$0x7] %vm435_vm2, %v1905_v14  ;;  %v486_v14 = vld [vmem:[%s2901_s3 + $0x4] sm:$0x7] }
  0x53   : > { %2926 = vst [vmem:[#allocation10_spill] sm:$0xff] %v2129_v52  ;;  %2927 = vst [vmem:[#allocation11_spill] sm:$0xff] %v2131_v53 }
  0x54   : > { %v546_v6 = vld [vmem:[#allocation2 + $0x39] sm:$0xff] }
  0x58   : > { %v722_v31 = vld [vmem:[#allocation2 + $0x111] sm:$0xff] }
 0x11a   : > { %v1664_v16 = vpop.f32.mrb[0].mxu0  ;;  %v1670_v17 = vpop.f32.mrb[0].mxu1 }
 0x11b   : > { %v359_v18 = vadd.f32 %v1664_v16, %v1617_v15  ;;  %v379_v19 = vadd.f32 %v1670_v17, %v1617_v15  ;;  %v353_v20 = vpop.f32.mrb[1].mxu0  ;;  %v373_v21 = vpop.f32.mrb[1].mxu1  ;;  %v538_v16 = vadd.f32 %v530_v63, %v502_v61 }
 0x11c   : > { %v354_v23 = vadd.f32 %v1617_v15, %v353_v20  ;;  %v374_v24 = vadd.f32 %v1617_v15, %v373_v21  ;;  %v558_v20 = vmul.f32 %v2138_v3, %v546_v6 }
 0x11d   : > { %v401_v25 = vmul.f32 0.70710677, %v359_v18  ;;  %v405_v26 = vmul.f32 0.70710677, %v379_v19  ;;  %v393_v50 = vmul.f32 0.5, %v359_v18  ;;  %v397_v55 = vmul.f32 0.5, %v379_v19 }
 0x11e   : > { %v400_v27 = vmul.f32 0.70710677, %v354_v23  ;;  %v404_v28 = vmul.f32 0.70710677, %v374_v24  ;;  %v1667_v29 = vpop.f32.mrb[2].mxu0  ;;  %v1673_v30 = vpop.f32.mrb[2].mxu1 }
 0x11f   : > { %1739 = verf.f32 %v401_v25  ;;  %v369_v32 = vadd.f32 %v1667_v29, %v1617_v15  ;;  %v389_v33 = vadd.f32 %v1673_v30, %v1617_v15  ;;  %v363_v34 = vpop.f32.mrb[3].mxu0  ;;  %v383_v35 = vpop.f32.mrb[3].mxu1  ;;  %v392_v59 = vmul.f32 0.5, %v354_v23  ;;  %v666_v25 = vld [vmem:[#allocation2 + $0x10f] sm:$0xff]  ;;  %v1627_v29 = vld [vmem:[%s2901_s3 + $0xc] sm:$0x7] }
 0x120   : > { %1741 = verf.f32 %v405_v26  ;;  %v364_v36 = vadd.f32 %v1617_v15, %v363_v34  ;;  %v384_v37 = vadd.f32 %v1617_v15, %v383_v35  ;;  %v396_v0 = vmul.f32 0.5, %v374_v24  ;;  %v487_v15 = vld [vmem:[%s2901_s3 + $0x8] sm:$0x7]  ;;  %v2161_v30 = vld [vmem:[#allocation2 + $0x110] sm:$0xff] }
 0x121   : > { %1743 = verf.f32 %v400_v27  ;;  %v403_v38 = vmul.f32 0.70710677, %v369_v32  ;;  %v407_v39 = vmul.f32 0.70710677, %v389_v33  ;;  %v395_v8 = vmul.f32 0.5, %v369_v32  ;;  %2928 = vst [vmem:[#allocation12_spill] sm:$0xff] %v2161_v30 }
 0x122   : > { %1745 = verf.f32 %v404_v28  ;;  %v402_v40 = vmul.f32 0.70710677, %v364_v36  ;;  %v406_v42 = vmul.f32 0.70710677, %v384_v37  ;;  %v399_v11 = vmul.f32 0.5, %v389_v33 }
 0x123   : > { %1747 = verf.f32 %v403_v38  ;;  %v394_v18 = vmul.f32 0.5, %v364_v36  ;;  %v398_v22 = vmul.f32 0.5, %v384_v37  ;;  %v2152_v26 = vrot.slane %v486_v14, %v2116_v41 }
 0x124   : > { %1749 = verf.f32 %v407_v39  ;;  %v2155_v27 = vrot.slane %v487_v15, %v2116_v41  ;;  %v2164_v34 = vrot.slane %v486_v14, %v2121_v44  ;;  %v2167_v35 = vrot.slane %v486_v14, %v2129_v52 }
 0x125   : > { %1751 = verf.f32 %v402_v40  ;;  %v2170_v36 = vrot.slane %v487_v15, %v2121_v44  ;;  %v2173_v37 = vrot.slane %v487_v15, %v2129_v52  ;;  %v2198_v61 = vrot.slane %v1627_v29, %v2129_v52 }
 0x126   : > { %1753 = verf.f32 %v406_v42  ;;  %v2180_v48 = vmul.f32 %v2155_v27, %v666_v25 }
 0x127   : > { %2929 = vst [vmem:[#allocation13_spill] sm:$0xff] %v2198_v61 }
 0x129   : > { %v1740_v46 = vpop.eup %1739 }
 0x12a   : > { %v1742_v49 = vpop.eup %1741  ;;  %v417_v51 = vadd.f32 1.0, %v1740_v46  ;;  %v566_v46 = vadd.f32 %v558_v20, %v538_v16 }
 0x12b   : > { %v1744_v54 = vpop.eup %1743  ;;  %v421_v56 = vadd.f32 1.0, %v1742_v49 }
 0x12c   : > { %v1746_v57 = vpop.eup %1745  ;;  %v425_v58 = vmul.f32 %v417_v51, %v393_v50  ;;  %v416_v60 = vadd.f32 1.0, %v1744_v54  ;;  %v2183_v50 = vrot.slane %v1627_v29, %v2116_v41  ;;  %v2186_v51 = vrot.slane %v1627_v29, %v2121_v44 }
 0x12d   : > { %v429_v62 = vmul.f32 %v421_v56, %v397_v55  ;;  %v420_v1 = vadd.f32 1.0, %v1746_v57  ;;  %v1748_v2 = vpop.eup %1747  ;;  %v2190_v54 = vmul.f32 %v2170_v36, %v2161_v30  ;;  %v2193_v55 = vmul.f32 %v2173_v37, %v722_v31 }
 0x12e   : > { %478 = vst.msk [vmem:[#allocation2 + $0x68] sm:$0xff] %vm432_vm1, %v425_v58  ;;  %v424_v4 = vmul.f32 %v416_v60, %v392_v59  ;;  %v1750_v5 = vpop.eup %1749  ;;  %v419_v9 = vadd.f32 1.0, %v1748_v2 }
 0x12f   : > { %482 = vst.msk [vmem:[#allocation2 + $0xc8] sm:$0xff] %vm432_vm1, %v429_v62  ;;  %v428_v7 = vmul.f32 %v420_v1, %v396_v0  ;;  %v1752_v10 = vpop.eup %1751  ;;  %v423_v12 = vadd.f32 1.0, %v1750_v5 }
 0x130   : > { %477 = vst.msk [vmem:[#allocation2 + $0x50] sm:$0xff] %vm432_vm1, %v424_v4  ;;  %v1754_v13 = vpop.eup %1753  ;;  %v427_v17 = vmul.f32 %v419_v9, %v395_v8  ;;  %v418_v19 = vadd.f32 1.0, %v1752_v10 }
 0x131   : > { %481 = vst.msk [vmem:[#allocation2 + $0xb0] sm:$0xff] %vm432_vm1, %v428_v7  ;;  %v431_v21 = vmul.f32 %v423_v12, %v399_v11  ;;  %v422_v23 = vadd.f32 1.0, %v1754_v13 }
 0x132   : > { %480 = vst.msk [vmem:[#allocation2 + $0x98] sm:$0xff] %vm432_vm1, %v427_v17  ;;  %v426_v24 = vmul.f32 %v418_v19, %v394_v18 }
 0x133   : > { %484 = vst.msk [vmem:[#allocation2 + $0xf8] sm:$0xff] %vm432_vm1, %v431_v21  ;;  %v430_v28 = vmul.f32 %v422_v23, %v398_v22 }
 0x134   : > { %479 = vst.msk [vmem:[#allocation2 + $0x80] sm:$0xff] %vm432_vm1, %v426_v24 }
 0x135   : > { %v492_v32 = vld [vmem:[#allocation2 + $0x67] sm:$0xff]  ;;  %483 = vst.msk [vmem:[#allocation2 + $0xe0] sm:$0xff] %vm432_vm1, %v430_v28 }
 0x136   : > { %v520_v33 = vld [vmem:[#allocation2 + $0x68] sm:$0xff]  ;;  %v504_v38 = vmul.f32 %v2124_v45, %v492_v32  ;;  %v587_v63 = vmul.f32 %v2152_v26, %v492_v32  ;;  %v671_v2 = vmul.f32 %v2155_v27, %v492_v32 }
 0x137   : > { %v532_v39 = vmul.f32 %v2127_v47, %v520_v33  ;;  %v548_v40 = vld [vmem:[#allocation2 + $0x69] sm:$0xff]  ;;  %v2203_v0 = vmul.f32 %v2164_v34, %v520_v33  ;;  %v699_v4 = vmul.f32 %v2170_v36, %v520_v33  ;;  %v547_v7 = vld [vmem:[#allocation2 + $0x51] sm:$0xff] }
 0x138   : > { %v496_v42 = vld [vmem:[#allocation2 + $0xc7] sm:$0xff]  ;;  %v491_v59 = vld [vmem:[#allocation2 + $0x4f] sm:$0xff]  ;;  %v560_v62 = vmul.f32 %v2138_v3, %v548_v40  ;;  %v2206_v1 = vmul.f32 %v2167_v35, %v548_v40  ;;  %v2211_v5 = vmul.f32 %v2173_v37, %v548_v40  ;;  %v559_v23 = vmul.f32 %v2138_v3, %v547_v7 }
 0x139   : > { %v524_v43 = vld [vmem:[#allocation2 + $0xc8] sm:$0xff]  ;;  %v540_v56 = vadd.f32 %v532_v39, %v504_v38  ;;  %v508_v57 = vmul.f32 %v2124_v45, %v496_v42  ;;  %v519_v60 = vld [vmem:[#allocation2 + $0x50] sm:$0xff]  ;;  %v2215_v8 = vmul.f32 %v2152_v26, %v496_v42  ;;  %v503_v10 = vmul.f32 %v2124_v45, %v491_v59  ;;  %v522_v19 = vld [vmem:[#allocation2 + $0x98] sm:$0xff] }
 0x13a   : > { %v552_v49 = vld [vmem:[#allocation2 + $0xc9] sm:$0xff]  ;;  %v536_v58 = vmul.f32 %v2127_v47, %v524_v43  ;;  %v2218_v9 = vmul.f32 %v2164_v34, %v524_v43  ;;  %v531_v11 = vmul.f32 %v2127_v47, %v519_v60  ;;  %v586_v17 = vmul.f32 %v2152_v26, %v491_v59  ;;  %v494_v18 = vld [vmem:[#allocation2 + $0x97] sm:$0xff] }
 0x13b   : > { %v564_v6 = vmul.f32 %v2138_v3, %v552_v49  ;;  %v495_v12 = vld [vmem:[#allocation2 + $0xaf] sm:$0xff]  ;;  %v568_v14 = vadd.f32 %v560_v62, %v540_v56  ;;  %v2223_v16 = vmul.f32 %v2167_v35, %v552_v49  ;;  %v2227_v20 = vmul.f32 %v2155_v27, %v496_v42  ;;  %v2236_v31 = vld [vmem:[#allocation2 + $0x99] sm:$0xff]  ;;  %v549_v44 = vld [vmem:[#allocation2 + $0x81] sm:$0xff] }
 0x13c   : > { %v523_v13 = vld [vmem:[#allocation2 + $0xb0] sm:$0xff]  ;;  %v544_v15 = vadd.f32 %v536_v58, %v508_v57  ;;  %v2230_v21 = vmul.f32 %v2170_v36, %v524_v43  ;;  %v539_v22 = vadd.f32 %v531_v11, %v503_v10  ;;  %v594_v24 = vadd.f32 %v586_v17, %v566_v46  ;;  %v521_v11 = vld [vmem:[#allocation2 + $0x80] sm:$0xff] }
 0x13d   : > { %v614_v25 = vmul.f32 %v2164_v34, %v519_v60  ;;  %v507_v28 = vmul.f32 %v2124_v45, %v495_v12  ;;  %v535_v29 = vmul.f32 %v2127_v47, %v523_v13  ;;  %v2239_v32 = vmul.f32 %v2173_v37, %v552_v49  ;;  %v581_v59 = vld [vmem:[#allocation2 + $0xf7] sm:$0xff] }
 0x13e   : > { %v567_v33 = vadd.f32 %v559_v23, %v539_v22  ;;  %v506_v38 = vmul.f32 %v2124_v45, %v494_v18  ;;  %v534_v39 = vmul.f32 %v2127_v47, %v522_v19  ;;  %v572_v40 = vadd.f32 %v564_v6, %v544_v15  ;;  %v609_v23 = vld [vmem:[#allocation2 + $0xf8] sm:$0xff] }
 0x13f   : > { %v622_v42 = vadd.f32 %v614_v25, %v594_v24  ;;  %v642_v43 = vmul.f32 %v2167_v35, %v547_v7  ;;  %v590_v46 = vmul.f32 %v2152_v26, %v495_v12  ;;  %v618_v56 = vmul.f32 %v2164_v34, %v523_v13  ;;  %v493_v7 = vld [vmem:[#allocation2 + $0x7f] sm:$0xff] }
 0x140   : > { %v2247_v57 = vmul.f32 %v2155_v27, %v495_v12  ;;  %v542_v58 = vadd.f32 %v534_v39, %v506_v38  ;;  %v562_v49 = vmul.f32 %v2138_v3, %v2236_v31  ;;  %v595_v60 = vadd.f32 %v587_v63, %v567_v33  ;;  %v2264_v63 = vld [vmem:[#allocation2 + $0xf9] sm:$0xff] }
 0x141   : > { %v650_v62 = vadd.f32 %v642_v43, %v622_v42  ;;  %v2251_v10 = vadd.f32 %v535_v29, %v507_v28  ;;  %v2254_v6 = vmul.f32 %v2170_v36, %v523_v13  ;;  %v589_v17 = vmul.f32 %v2152_v26, %v494_v18  ;;  %v2271_v29 = vld [vmem:[#allocation2 + $0xdf] sm:$0xff] }
 0x142   : > { %v570_v15 = vadd.f32 %v562_v49, %v542_v58  ;;  %v2258_v12 = vmul.f32 %v2164_v34, %v522_v19  ;;  %v2262_v22 = vmul.f32 %v2167_v35, %v2236_v31  ;;  %v673_v25 = vmul.f32 %v2155_v27, %v494_v18  ;;  %v2276_v43 = vld [vmem:[#allocation2 + $0xe0] sm:$0xff] }
 0x143   : > { %v679_v24 = vadd.f32 %v671_v2, %v650_v62  ;;  %v2268_v13 = vmul.f32 %v2170_v36, %v522_v19  ;;  %v593_v28 = vmul.f32 %v2152_v26, %v581_v59  ;;  %v505_v38 = vmul.f32 %v2124_v45, %v493_v7 }
 0x144   : > { %v598_v33 = vadd.f32 %v590_v46, %v570_v15  ;;  %v533_v39 = vmul.f32 %v2127_v47, %v521_v11  ;;  %v588_v42 = vmul.f32 %v2152_v26, %v493_v7  ;;  %v621_v2 = vmul.f32 %v2164_v34, %v609_v23  ;;  %v2285_v46 = vld [vmem:[%s2902_s4] ss:$0 sm:$0xff] }
 0x145   : > { %v707_v58 = vadd.f32 %v699_v4, %v679_v24  ;;  %v649_v18 = vmul.f32 %v2167_v35, %v2264_v63  ;;  %v623_v19 = vadd.f32 %v2203_v0, %v595_v60  ;;  %v677_v49 = vmul.f32 %v2155_v27, %v581_v59  ;;  %v2291_v24 = vld [vmem:[#allocation2 + $0xe1] sm:$0xff] }
 0x146   : > { %v596_v62 = vadd.f32 %v588_v42, %v568_v14  ;;  %v616_v15 = vmul.f32 %v2164_v34, %v521_v11  ;;  %v509_v4 = vmul.f32 %v2124_v45, %v2271_v29  ;;  %v672_v0 = vmul.f32 %v2155_v27, %v493_v7 }
 0x147   : > { %v735_v30 = vadd.f32 %v2211_v5, %v707_v58  ;;  %v651_v52 = vadd.f32 %v2206_v1, %v623_v19  ;;  %v537_v60 = vmul.f32 %v2127_v47, %v2276_v43  ;;  %v626_v53 = vadd.f32 %v618_v56, %v598_v33  ;;  %v551_v33 = vld [vmem:[#allocation2 + $0xb1] sm:$0xff] }
 0x148   : > { %v541_v59 = vadd.f32 %v533_v39, %v505_v38  ;;  %v700_v14 = vmul.f32 %v2170_v36, %v521_v11  ;;  %v592_v42 = vmul.f32 %v2152_v26, %v2271_v29  ;;  %v565_v1 = vmul.f32 %v2138_v3, %v2291_v24 }
 0x149   : > { %v2302_v45 = vadd.f32 %v2285_v46, %v735_v30  ;;  %v680_v61 = vadd.f32 %v672_v0, %v651_v52  ;;  %v545_v5 = vadd.f32 %v537_v60, %v509_v4  ;;  %v624_v7 = vadd.f32 %v616_v15, %v596_v62 }
 0x14a   : > { %v600_v58 = vadd.f32 %v592_v42, %v572_v40  ;;  %v620_v47 = vmul.f32 %v2164_v34, %v2276_v43  ;;  %v561_v56 = vmul.f32 %v2138_v3, %v549_v44  ;;  %v648_v30 = vmul.f32 %v2167_v35, %v2291_v24 }
 0x14b   : > { %v763_v11 = vmul.f32 0.70710677, %v2302_v45  ;;  %v708_v38 = vadd.f32 %v700_v14, %v680_v61  ;;  %v573_v26 = vadd.f32 %v565_v1, %v545_v5  ;;  %v644_v19 = vmul.f32 %v2167_v35, %v549_v44 }
 0x14c   : > { %v628_v52 = vadd.f32 %v620_v47, %v600_v58  ;;  %v569_v39 = vadd.f32 %v561_v56, %v541_v59  ;;  %v728_v62 = vmul.f32 %v2173_v37, %v549_v44  ;;  %v563_v34 = vmul.f32 %v2138_v3, %v551_v33 }
 0x14d   : > { %1755 = verf.f32 %v763_v11  ;;  %v601_v40 = vadd.f32 %v593_v28, %v573_v26  ;;  %v646_v15 = vmul.f32 %v2167_v35, %v551_v33  ;;  %v652_v60 = vadd.f32 %v644_v19, %v624_v7 }
 0x14e   : > { %v656_v4 = vadd.f32 %v648_v30, %v628_v52  ;;  %v597_v0 = vadd.f32 %v589_v17, %v569_v39  ;;  %v736_v61 = vadd.f32 %v728_v62, %v708_v38  ;;  %v705_v14 = vmul.f32 %v2170_v36, %v609_v23 }
 0x14f   : > { %v629_v42 = vadd.f32 %v621_v2, %v601_v40  ;;  %v571_v5 = vadd.f32 %v563_v34, %v2251_v10  ;;  %v654_v59 = vadd.f32 %v646_v15, %v626_v53  ;;  %v681_v44 = vadd.f32 %v673_v25, %v652_v60  ;;  %v865_v40 = vld [vmem:[#allocation2 + $0x22] sm:$0xff] }
 0x150   : > { %v685_v1 = vadd.f32 %v677_v49, %v656_v4  ;;  %v625_v58 = vadd.f32 %v2258_v12, %v597_v0  ;;  %v748_v28 = vadd.f32 %v2285_v46, %v736_v61  ;;  %v729_v3 = vmul.f32 %v2173_v37, %v2236_v31  ;;  %v810_v0 = vld [vmem:[#allocation2 + $0x36] sm:$0xff] }
 0x151   : > { %v657_v35 = vadd.f32 %v649_v18, %v629_v42  ;;  %v599_v17 = vadd.f32 %v2215_v8, %v571_v5  ;;  %v683_v7 = vadd.f32 %v2227_v20, %v654_v59  ;;  %v733_v23 = vmul.f32 %v2173_v37, %v2264_v63  ;;  %v809_v63 = vld [vmem:[#allocation2 + $0x1e] sm:$0xff]  ;;  %v2931_v42 = vld [vmem:[#allocation13_spill] sm:$0xff] }
 0x152   : > { %v713_v2 = vadd.f32 %v705_v14, %v685_v1  ;;  %v653_v53 = vadd.f32 %v2262_v22, %v625_v58  ;;  %v709_v10 = vadd.f32 %v2268_v13, %v681_v44  ;;  %v764_v12 = vmul.f32 0.70710677, %v748_v28 }
 0x153   : > { %v627_v25 = vadd.f32 %v2218_v9, %v599_v17  ;;  %v711_v49 = vadd.f32 %v2230_v21, %v683_v7  ;;  %v686_v31 = vadd.f32 %v2180_v48, %v657_v35  ;;  %v676_v8 = vmul.f32 %v2155_v27, %v2271_v29  ;;  %v1629_v35 = vld [vmem:[%s2901_s3 + $0x14] sm:$0x7]  ;;  %v866_v17 = vld [vmem:[#allocation2 + $0x3a] sm:$0xff] }
 0x154   : > { %v741_v18 = vadd.f32 %v733_v23, %v713_v2  ;;  %v682_v20 = vadd.f32 %v2247_v57, %v653_v53  ;;  %v737_v47 = vadd.f32 %v729_v3, %v709_v10  ;;  %1757 = verf.f32 %v764_v12  ;;  %v2390_v23 = vld [vmem:[%s2901_s3 + $0x18] sm:$0x7]  ;;  %v2934_v53 = vld [vmem:[#allocation9_spill] sm:$0xff] }
 0x155   : > { %v655_v22 = vadd.f32 %v2223_v16, %v627_v25  ;;  %v739_v13 = vadd.f32 %v2239_v32, %v711_v49  ;;  %v714_v56 = vadd.f32 %v2190_v54, %v686_v31  ;;  %v704_v9 = vmul.f32 %v2170_v36, %v2276_v43  ;;  %v2349_v43 = vld [vmem:[#allocation2 + $0x20] sm:$0xff]  ;;  %v2935_v12 = vld [vmem:[#allocation10_spill] sm:$0xff] }
 0x156   : > { %v753_v48 = vadd.f32 %v2285_v46, %v741_v18  ;;  %v710_v21 = vadd.f32 %v2254_v6, %v682_v20  ;;  %v2342_v27 = vadd.f32 %v2285_v46, %v737_v47  ;;  %v730_v11 = vmul.f32 %v2173_v37, %v551_v33 }
 0x157   : > { %v1756_v57 = vpop.eup %1755  ;;  %v684_v29 = vadd.f32 %v676_v8, %v655_v22  ;;  %v751_v16 = vadd.f32 %v2285_v46, %v739_v13  ;;  %v742_v32 = vadd.f32 %v2193_v55, %v714_v56  ;;  %v755_v54 = vmul.f32 0.5, %v2302_v45  ;;  %v1628_v45 = vld [vmem:[%s2901_s3 + $0x10] sm:$0x7] }
 0x158   : > { %v779_v38 = vadd.f32 1.0, %v1756_v57  ;;  %v769_v26 = vmul.f32 0.70710677, %v753_v48  ;;  %v821_v36 = vmul.f32 %v2183_v50, %v809_v63  ;;  %v732_v6 = vmul.f32 %v2173_v37, %v2291_v24 }
 0x159   : > { %v765_v30 = vmul.f32 0.70710677, %v2342_v27  ;;  %v712_v52 = vadd.f32 %v704_v9, %v684_v29  ;;  %v738_v39 = vadd.f32 %v730_v11, %v710_v21  ;;  %v767_v19 = vmul.f32 0.70710677, %v751_v16 }
 0x15a   : > { %v2354_v33 = vmul.f32 %v779_v38, %v755_v54  ;;  %1759 = verf.f32 %v769_v26  ;;  %v2357_v55 = vadd.f32 %v2285_v46, %v742_v32  ;;  %v849_v62 = vmul.f32 %v2186_v51, %v2349_v43  ;;  %v984_v32 = vld [vmem:[#allocation2 + $0x10e] sm:$0xff] }
 0x15b   : > { %1761 = verf.f32 %v765_v30  ;;  %v740_v37 = vadd.f32 %v732_v6, %v712_v52  ;;  %v2365_v24 = vadd.f32 %v2285_v46, %v738_v39  ;;  %v2375_v60 = vrot.slane %v1628_v45, %v2116_v41  ;;  %v1127_v6 = vld [vmem:[#allocation2 + $0x5] sm:$0xff] }
 0x15c   : > { %2930 = vst [vmem:[#allocation14_spill] sm:$0xff] %v2354_v33  ;;  %795 = vst.msk [vmem:[#allocation2 + $0x50] sm:$0xff] %vm432_vm1, %v2354_v33  ;;  %1763 = verf.f32 %v767_v19  ;;  %v770_v34 = vmul.f32 0.70710677, %v2357_v55  ;;  %v857_v14 = vadd.f32 %v849_v62, %v821_v36  ;;  %v877_v5 = vmul.f32 %v2931_v42, %v865_v40  ;;  %v1155_v19 = vld [vmem:[#allocation2 + $0x8] sm:$0xff] }
 0x15d   : > { %v2371_v15 = vadd.f32 %v2285_v46, %v740_v37  ;;  %v766_v4 = vmul.f32 0.70710677, %v2365_v24  ;;  %v756_v1 = vmul.f32 0.5, %v748_v28  ;;  %v822_v44 = vmul.f32 %v2183_v50, %v810_v0  ;;  %v2932_v46 = vld [vmem:[#allocation11_spill] sm:$0xff] }
 0x15e   : > { %1765 = verf.f32 %v770_v34  ;;  %v1758_v61 = vpop.eup %1757  ;;  %v850_v3 = vmul.f32 %v2186_v51, %v2932_v46  ;;  %v885_v28 = vadd.f32 %v877_v5, %v857_v14  ;;  %v2393_v10 = vrot.slane %v1628_v45, %v2934_v53 }
 0x15f   : > { %v768_v59 = vmul.f32 0.70710677, %v2371_v15  ;;  %1767 = verf.f32 %v766_v4  ;;  %v780_v58 = vadd.f32 1.0, %v1758_v61  ;;  %v2396_v25 = vrot.slane %v1628_v45, %v2935_v12 }
 0x160   : > { %v2400_v18 = vrot.slane %v1629_v35, %v2116_v41  ;;  %v858_v20 = vadd.f32 %v850_v3, %v822_v44  ;;  %v878_v47 = vmul.f32 %v2931_v42, %v866_v17  ;;  %v761_v22 = vmul.f32 0.5, %v753_v48 }
 0x161   : > { %1769 = verf.f32 %v768_v59  ;;  %v2385_v7 = vmul.f32 %v780_v58, %v756_v1  ;;  %v2406_v56 = vrot.slane %v1629_v35, %v2934_v53  ;;  %v2410_v9 = vrot.slane %v2390_v23, %v2116_v41 }
 0x162   : > { %v757_v57 = vmul.f32 0.5, %v2342_v27  ;;  %v759_v11 = vmul.f32 0.5, %v751_v16  ;;  %v2415_v54 = vrot.slane %v2390_v23, %v2934_v53  ;;  %v2424_v27 = vrot.slane %v1629_v35, %v2935_v12 }
 0x163   : > { %2933 = vst [vmem:[#allocation13_spill] sm:$0xff] %v2385_v7  ;;  %v893_v2 = vld [vmem:[#allocation2 + $0x4e] sm:$0xff]  ;;  %796 = vst.msk [vmem:[#allocation2 + $0x68] sm:$0xff] %vm432_vm1, %v2385_v7  ;;  %v886_v16 = vadd.f32 %v878_v47, %v858_v20  ;;  %v762_v37 = vmul.f32 0.5, %v2357_v55  ;;  %v2432_v34 = vmul.f32 %v2400_v18, %v984_v32  ;;  %v758_v61 = vmul.f32 0.5, %v2365_v24 }
 0x164   : > { %v1760_v49 = vpop.eup %1759  ;;  %v905_v31 = vmul.f32 %v2375_v60, %v893_v2  ;;  %v921_v8 = vld [vmem:[#allocation2 + $0x50] sm:$0xff]  ;;  %v823_v26 = vmul.f32 %v893_v2, %v2183_v50  ;;  %v1139_v5 = vmul.f32 %v2410_v9, %v1127_v6  ;;  %v760_v1 = vmul.f32 0.5, %v2371_v15  ;;  %v985_v2 = vld [vmem:[#allocation2 + $0x126] sm:$0xff] }
 0x165   : > { %v1762_v63 = vpop.eup %1761  ;;  %v785_v13 = vadd.f32 1.0, %v1760_v49  ;;  %v851_v36 = vmul.f32 %v921_v8, %v2186_v51  ;;  %v933_v4 = vmul.f32 %v2393_v10, %v921_v8  ;;  %v949_v0 = vld [vmem:[#allocation2 + $0x52] sm:$0xff]  ;;  %v1167_v3 = vmul.f32 %v2415_v54, %v1155_v19  ;;  %v2448_v49 = vld [vmem:[#allocation2 + $0x128] sm:$0xff] }
 0x166   : > { %v1764_v21 = vpop.eup %1763  ;;  %v781_v29 = vadd.f32 1.0, %v1762_v63  ;;  %v913_v39 = vadd.f32 %v905_v31, %v885_v28  ;;  %v961_v15 = vmul.f32 %v2396_v25, %v949_v0  ;;  %v1040_v20 = vld [vmem:[#allocation2 + $0x112] sm:$0xff]  ;;  %v2457_v47 = vrot.slane %v2390_v23, %v2935_v12 }
 0x167   : > { %v2417_v38 = vmul.f32 %v785_v13, %v761_v22  ;;  %v783_v48 = vadd.f32 1.0, %v1764_v21  ;;  %v859_v55 = vadd.f32 %v851_v36, %v823_v26  ;;  %v879_v22 = vmul.f32 %v949_v0, %v2931_v42 }
 0x168   : > { %v1766_v30 = vpop.eup %1765  ;;  %v2421_v52 = vmul.f32 %v781_v29, %v757_v57  ;;  %v941_v35 = vadd.f32 %v933_v4, %v913_v39  ;;  %v1041_v29 = vld [vmem:[#allocation2 + $0x12a] sm:$0xff]  ;;  %v2470_v23 = vmul.f32 %v2400_v18, %v985_v2  ;;  %v2474_v36 = vmul.f32 %v2406_v56, %v2448_v49 }
 0x169   : > { %2936 = vst [vmem:[#allocation11_spill] sm:$0xff] %v2417_v38  ;;  %v1768_v45 = vpop.eup %1767  ;;  %801 = vst.msk [vmem:[#allocation2 + $0xe0] sm:$0xff] %vm432_vm1, %v2417_v38  ;;  %v2428_v62 = vmul.f32 %v783_v48, %v759_v11  ;;  %v786_v40 = vadd.f32 1.0, %v1766_v30  ;;  %v1183_v11 = vld [vmem:[#allocation2 + $0xb] sm:$0xff]  ;;  %v887_v30 = vadd.f32 %v879_v22, %v859_v55 }
 0x16a   : > { %2937 = vst [vmem:[#allocation9_spill] sm:$0xff] %v2421_v52  ;;  %797 = vst.msk [vmem:[#allocation2 + $0x80] sm:$0xff] %vm432_vm1, %v2421_v52  ;;  %v782_v14 = vadd.f32 1.0, %v1768_v45  ;;  %v894_v58 = vld [vmem:[#allocation2 + $0x66] sm:$0xff]  ;;  %v969_v6 = vadd.f32 %v961_v15, %v941_v35 }
 0x16b   : > { %2938 = vst [vmem:[#allocation10_spill] sm:$0xff] %v2428_v62  ;;  %v1770_v59 = vpop.eup %1769  ;;  %799 = vst.msk [vmem:[#allocation2 + $0xb0] sm:$0xff] %vm432_vm1, %v2428_v62  ;;  %v922_v44 = vld [vmem:[#allocation2 + $0x68] sm:$0xff]  ;;  %v2442_v46 = vmul.f32 %v786_v40, %v762_v37  ;;  %v906_v24 = vmul.f32 %v2375_v60, %v894_v58  ;;  %v824_v31 = vmul.f32 %v894_v58, %v2183_v50 }
 0x16c   : > { %v784_v17 = vadd.f32 1.0, %v1770_v59  ;;  %v2445_v28 = vmul.f32 %v782_v14, %v758_v61  ;;  %v852_v8 = vmul.f32 %v922_v44, %v2186_v51  ;;  %v934_v21 = vmul.f32 %v2393_v10, %v922_v44  ;;  %v950_v57 = vld [vmem:[#allocation2 + $0x6a] sm:$0xff] }
 0x16d   : > { %2939 = vst [vmem:[#allocation15_spill] sm:$0xff] %v2442_v46  ;;  %802 = vst.msk [vmem:[#allocation2 + $0xf8] sm:$0xff] %vm432_vm1, %v2442_v46  ;;  %v914_v13 = vadd.f32 %v906_v24, %v886_v16  ;;  %v2942_v48 = vld [vmem:[#allocation12_spill] sm:$0xff]  ;;  %v2485_v37 = vmul.f32 %v2424_v27, %v1040_v20  ;;  %v880_v0 = vmul.f32 %v950_v57, %v2931_v42 }
 0x16e   : > { %2940 = vst [vmem:[#allocation16_spill] sm:$0xff] %v2445_v28  ;;  %v2459_v63 = vmul.f32 %v784_v17, %v760_v1  ;;  %798 = vst.msk [vmem:[#allocation2 + $0x98] sm:$0xff] %vm432_vm1, %v2445_v28  ;;  %v860_v32 = vadd.f32 %v852_v8, %v824_v31  ;;  %v2467_v26 = vmul.f32 %v2406_v56, %v2942_v48 }
 0x16f   : > { %v942_v39 = vadd.f32 %v934_v21, %v914_v13  ;;  %v2489_v61 = vmul.f32 %v2424_v27, %v1041_v29  ;;  %v2491_v14 = vadd.f32 %v1167_v3, %v1139_v5  ;;  %v2494_v59 = vmul.f32 %v2457_v47, %v1183_v11 }
 0x170   : > { %2941 = vst [vmem:[#allocation17_spill] sm:$0xff] %v2459_v63  ;;  %800 = vst.msk [vmem:[#allocation2 + $0xc8] sm:$0xff] %vm432_vm1, %v2459_v63  ;;  %v2478_v16 = vld [vmem:[#allocation2 + $0xde] sm:$0xff]  ;;  %v962_v44 = vmul.f32 %v2396_v25, %v950_v57  ;;  %v888_v2 = vadd.f32 %v880_v0, %v860_v32 }
 0x171   : > { %v2480_v19 = vld [vmem:[#allocation2 + $0xe0] sm:$0xff]  ;;  %v2501_v35 = vmul.f32 %v2400_v18, %v2478_v16 }
 0x172   : > { %v2482_v45 = vld [vmem:[#allocation2 + $0xe2] sm:$0xff]  ;;  %v980_v24 = vld [vmem:[#allocation2 + $0xae] sm:$0xff]  ;;  %v2506_v5 = vmul.f32 %v2406_v56, %v2480_v19  ;;  %v970_v20 = vadd.f32 %v962_v44, %v942_v39 }
 0x173   : > { %v978_v40 = vld [vmem:[#allocation2 + $0x7e] sm:$0xff]  ;;  %v2510_v3 = vmul.f32 %v2424_v27, %v2482_v45  ;;  %v992_v32 = vmul.f32 %v2400_v18, %v980_v24  ;;  %v909_v44 = vmul.f32 %v980_v24, %v2375_v60 }
 0x174   : > { %v1006_v4 = vld [vmem:[#allocation2 + $0x80] sm:$0xff]  ;;  %v990_v1 = vmul.f32 %v2400_v18, %v978_v40  ;;  %v907_v58 = vmul.f32 %v978_v40, %v2375_v60  ;;  %v825_v29 = vmul.f32 %v978_v40, %v2183_v50 }
 0x175   : > { %v1034_v55 = vld [vmem:[#allocation2 + $0x82] sm:$0xff]  ;;  %v1018_v17 = vmul.f32 %v2406_v56, %v1006_v4  ;;  %v935_v8 = vmul.f32 %v1006_v4, %v2393_v10  ;;  %v2515_v21 = vld [vmem:[#allocation2 + $0x96] sm:$0xff]  ;;  %v853_v11 = vmul.f32 %v1006_v4, %v2186_v51 }
 0x176   : > { %v998_v15 = vadd.f32 %v990_v1, %v969_v6  ;;  %v915_v31 = vadd.f32 %v907_v58, %v887_v30  ;;  %v1046_v22 = vmul.f32 %v2424_v27, %v1034_v55  ;;  %v963_v13 = vmul.f32 %v1034_v55, %v2396_v25  ;;  %v2517_v57 = vld [vmem:[#allocation2 + $0x98] sm:$0xff]  ;;  %v1008_v6 = vld [vmem:[#allocation2 + $0xb0] sm:$0xff]  ;;  %v2529_v1 = vld [vmem:[%s2902_s4 + $0x1] ss:$0 sm:$0xff] }
 0x177   : > { %v1036_v30 = vld [vmem:[#allocation2 + $0xb2] sm:$0xff]  ;;  %v991_v39 = vmul.f32 %v2400_v18, %v2515_v21  ;;  %v2524_v0 = vld [vmem:[#allocation2 + $0x9a] sm:$0xff]  ;;  %v1019_v40 = vmul.f32 %v2406_v56, %v2517_v57  ;;  %v861_v4 = vadd.f32 %v853_v11, %v825_v29  ;;  %v881_v58 = vmul.f32 %v1034_v55, %v2931_v42 }
 0x178   : > { %v1026_v48 = vadd.f32 %v1018_v17, %v998_v15  ;;  %v943_v46 = vadd.f32 %v935_v8, %v915_v31  ;;  %v908_v8 = vmul.f32 %v2515_v21, %v2375_v60  ;;  %v1020_v38 = vmul.f32 %v2406_v56, %v1008_v6 }
 0x179   : > { %v999_v31 = vadd.f32 %v991_v39, %v970_v20  ;;  %v1048_v63 = vmul.f32 %v2424_v27, %v1036_v30  ;;  %v1047_v62 = vmul.f32 %v2424_v27, %v2524_v0  ;;  %v889_v52 = vadd.f32 %v881_v58, %v861_v4 }
 0x17a   : > { %v1054_v17 = vadd.f32 %v1046_v22, %v1026_v48  ;;  %v971_v15 = vadd.f32 %v963_v13, %v943_v46  ;;  %v916_v28 = vadd.f32 %v908_v8, %v888_v2  ;;  %v937_v46 = vmul.f32 %v1008_v6, %v2393_v10  ;;  %v2545_v22 = vld [vmem:[#allocation2 + $0xc6] sm:$0xff] }
 0x17b   : > { %v1027_v55 = vadd.f32 %v1019_v40, %v999_v31  ;;  %v917_v33 = vadd.f32 %v909_v44, %v889_v52  ;;  %v936_v20 = vmul.f32 %v2517_v57, %v2393_v10  ;;  %v827_v13 = vmul.f32 %v980_v24, %v2183_v50  ;;  %v2551_v52 = vld [vmem:[#allocation2 + $0xc8] sm:$0xff] }
 0x17c   : > { %v1066_v29 = vadd.f32 %v2529_v1, %v1054_v17  ;;  %v1000_v11 = vadd.f32 %v992_v32, %v971_v15  ;;  %v965_v4 = vmul.f32 %v1036_v30, %v2396_v25  ;;  %v964_v2 = vmul.f32 %v2524_v0, %v2396_v25  ;;  %v2559_v15 = vld [vmem:[#allocation2 + $0xca] sm:$0xff] }
 0x17d   : > { %v1055_v7 = vadd.f32 %v1047_v62, %v1027_v55  ;;  %v945_v58 = vadd.f32 %v937_v46, %v917_v33  ;;  %v944_v17 = vadd.f32 %v936_v20, %v916_v28  ;;  %v855_v32 = vmul.f32 %v1008_v6, %v2186_v51  ;;  %v2573_v20 = vld [vmem:[#allocation2 + $0xf6] sm:$0xff] }
 0x17e   : > { %v1082_v48 = vmul.f32 0.70710677, %v1066_v29  ;;  %v1028_v39 = vadd.f32 %v1020_v38, %v1000_v11  ;;  %v993_v38 = vmul.f32 %v2400_v18, %v2545_v22  ;;  %v883_v28 = vmul.f32 %v1036_v30, %v2931_v42 }
 0x17f   : > { %v2555_v44 = vadd.f32 %v2529_v1, %v1055_v7  ;;  %v973_v62 = vadd.f32 %v965_v4, %v945_v58  ;;  %v972_v24 = vadd.f32 %v964_v2, %v944_v17  ;;  %v863_v33 = vadd.f32 %v855_v32, %v827_v13  ;;  %v2586_v58 = vld [vmem:[%s2901_s3 + $0x1c] sm:$0x7] }
 0x180   : > { %1771 = verf.f32 %v1082_v48  ;;  %v1056_v40 = vadd.f32 %v1048_v63, %v1028_v39  ;;  %v1021_v63 = vmul.f32 %v2406_v56, %v2551_v52  ;;  %v911_v7 = vmul.f32 %v2478_v16, %v2375_v60 }
 0x181   : > { %v1083_v6 = vmul.f32 0.70710677, %v2555_v44  ;;  %v1002_v8 = vadd.f32 %v2501_v35, %v973_v62  ;;  %v1001_v11 = vadd.f32 %v993_v38, %v972_v24  ;;  %v891_v55 = vadd.f32 %v883_v28, %v863_v33  ;;  %v2595_v62 = vld [vmem:[#allocation2 + $0xf8] sm:$0xff] }
 0x182   : > { %v2563_v31 = vadd.f32 %v2529_v1, %v1056_v40  ;;  %v828_v46 = vmul.f32 %v2545_v22, %v2183_v50  ;;  %v1049_v13 = vmul.f32 %v2424_v27, %v2559_v15  ;;  %v856_v48 = vmul.f32 %v2551_v52, %v2186_v51  ;;  %v2597_v33 = vld [vmem:[#allocation2 + $0xfa] sm:$0xff] }
 0x183   : > { %1773 = verf.f32 %v1083_v6  ;;  %v1030_v16 = vadd.f32 %v2506_v5, %v1002_v8  ;;  %v1029_v39 = vadd.f32 %v1021_v63, %v1001_v11  ;;  %v919_v35 = vadd.f32 %v911_v7, %v891_v55 }
 0x184   : > { %v1084_v30 = vmul.f32 0.70710677, %v2563_v31  ;;  %v939_v4 = vmul.f32 %v2480_v19, %v2393_v10  ;;  %v864_v17 = vadd.f32 %v856_v48, %v828_v46  ;;  %v884_v2 = vmul.f32 %v2559_v15, %v2931_v42 }
 0x185   : > { %v912_v32 = vmul.f32 %v2375_v60, %v2573_v20  ;;  %v1058_v5 = vadd.f32 %v2510_v3, %v1030_v16  ;;  %v1057_v40 = vadd.f32 %v1049_v13, %v1029_v39  ;;  %v967_v19 = vmul.f32 %v2482_v45, %v2396_v25 }
 0x186   : > { %1775 = verf.f32 %v1084_v30  ;;  %v947_v38 = vadd.f32 %v939_v4, %v919_v35  ;;  %v892_v24 = vadd.f32 %v884_v2, %v864_v17  ;;  %v826_v28 = vmul.f32 %v2515_v21, %v2183_v50  ;;  %v1129_v4 = vld [vmem:[#allocation2 + $0x35] sm:$0xff] }
 0x187   : > { %v854_v6 = vmul.f32 %v2517_v57, %v2186_v51  ;;  %v2605_v63 = vrot.slane %v2586_v58, %v2116_v41  ;;  %v1074_v3 = vmul.f32 0.5, %v1066_v29  ;;  %v2608_v7 = vadd.f32 %v2529_v1, %v1058_v5  ;;  %v1128_v57 = vld [vmem:[#allocation2 + $0x1d] sm:$0xff] }
 0x188   : > { %v2611_v45 = vadd.f32 %v2529_v1, %v1057_v40  ;;  %v975_v8 = vadd.f32 %v967_v19, %v947_v38  ;;  %v920_v55 = vadd.f32 %v912_v32, %v892_v24  ;;  %v940_v50 = vmul.f32 %v2393_v10, %v2595_v62 }
 0x189   : > { %v862_v21 = vadd.f32 %v854_v6, %v826_v28  ;;  %v882_v51 = vmul.f32 %v2524_v0, %v2931_v42  ;;  %v1086_v29 = vmul.f32 0.70710677, %v2608_v7  ;;  %v968_v30 = vmul.f32 %v2396_v25, %v2597_v33 }
 0x18a   : > { %v1772_v11 = vpop.eup %1771  ;;  %v910_v13 = vmul.f32 %v2545_v22, %v2375_v60  ;;  %v1085_v48 = vmul.f32 0.70710677, %v2611_v45  ;;  %v1004_v16 = vadd.f32 %v2432_v34, %v975_v8  ;;  %v948_v39 = vadd.f32 %v940_v50, %v920_v55  ;;  %v1157_v22 = vld [vmem:[#allocation2 + $0x38] sm:$0xff] }
 0x18b   : > { %v1098_v46 = vadd.f32 1.0, %v1772_v11  ;;  %v890_v35 = vadd.f32 %v882_v51, %v862_v21  ;;  %1777 = verf.f32 %v1086_v29  ;;  %v938_v42 = vmul.f32 %v2551_v52, %v2393_v10  ;;  %v1185_v50 = vld [vmem:[#allocation2 + $0x3b] sm:$0xff] }
 0x18c   : > { %v1140_v0 = vmul.f32 %v2410_v9, %v1128_v57  ;;  %1779 = verf.f32 %v1085_v48  ;;  %v1032_v32 = vadd.f32 %v2467_v26, %v1004_v16  ;;  %v976_v5 = vadd.f32 %v968_v30, %v948_v39 }
 0x18d   : > { %v1106_v17 = vmul.f32 %v1098_v46, %v1074_v3  ;;  %v1774_v2 = vpop.eup %1773  ;;  %v918_v60 = vadd.f32 %v910_v13, %v890_v35  ;;  %v1075_v34 = vmul.f32 0.5, %v2555_v44  ;;  %v1168_v10 = vmul.f32 %v2415_v54, %v2349_v43 }
 0x18e   : > { %v1099_v40 = vadd.f32 1.0, %v1774_v2  ;;  %v1141_v52 = vmul.f32 %v2410_v9, %v1129_v4  ;;  %v1060_v19 = vadd.f32 %v2485_v37, %v1032_v32  ;;  %v1005_v26 = vadd.f32 %v2470_v23, %v976_v5  ;;  %v1184_v23 = vld [vmem:[#allocation2 + $0x23] sm:$0xff] }
 0x18f   : > { %1440 = vrot.lane.b32.xlu0 %v1106_v17, %s1906_s15  ;;  %1114 = vst.msk [vmem:[#allocation2 + $0x50] sm:$0xff] %vm432_vm1, %v1106_v17  ;;  %v946_v24 = vadd.f32 %v938_v42, %v918_v60  ;;  %v966_v28 = vmul.f32 %v2559_v15, %v2396_v25  ;;  %v1076_v6 = vmul.f32 0.5, %v2563_v31  ;;  %v1169_v44 = vmul.f32 %v2415_v54, %v1157_v22 }
 0x190   : > { %v1776_v38 = vpop.eup %1775  ;;  %v1107_v8 = vmul.f32 %v1099_v40, %v1075_v34  ;;  %v2641_v11 = vadd.f32 %v2529_v1, %v1060_v19  ;;  %v1033_v43 = vadd.f32 %v2474_v36, %v1005_v26  ;;  %v995_v37 = vmul.f32 %v2400_v18, %v2573_v20  ;;  %v1302_v40 = vld [vmem:[#allocation2 + $0x125] sm:$0xff] }
 0x191   : > { %v1100_v3 = vadd.f32 1.0, %v1776_v38  ;;  %v974_v55 = vadd.f32 %v966_v28, %v946_v24  ;;  %v1203_v25 = vadd.f32 %v2494_v59, %v2491_v14  ;;  %v2652_v15 = vrot.slane %v2586_v58, %v2934_v53  ;;  %v1633_v14 = vld [vmem:[%s2901_s3 + $0x20] sm:$0x7]  ;;  %v1358_v38 = vld [vmem:[#allocation2 + $0x12b] sm:$0xff] }
 0x192   : > { %1115 = vst.msk [vmem:[#allocation2 + $0x68] sm:$0xff] %vm432_vm1, %v1107_v8  ;;  %v2656_v36 = vrot.slane %v2586_v58, %v2935_v12  ;;  %v1088_v18 = vmul.f32 0.70710677, %v2641_v11  ;;  %v1061_v31 = vadd.f32 %v2489_v61, %v1033_v43  ;;  %v1023_v51 = vmul.f32 %v2406_v56, %v2595_v62  ;;  %v1803_v24 = vld [vmem:[#allocation2 + $0x110] sm:$0xff] }
 0x193   : > { %v1108_v21 = vmul.f32 %v1100_v3, %v1076_v6  ;;  %1442 = vrot.lane.b32.xlu0 %v1107_v8, %s1906_s15  ;;  %v1003_v20 = vadd.f32 %v995_v37, %v974_v55  ;;  %v1176_v59 = vadd.f32 %v1168_v10, %v1140_v0  ;;  %v1196_v58 = vmul.f32 %v2457_v47, %v1184_v23 }
 0x194   : > { %v1177_v57 = vadd.f32 %v1169_v44, %v1141_v52  ;;  %v1197_v46 = vmul.f32 %v2457_v47, %v1185_v50  ;;  %1781 = verf.f32 %v1088_v18  ;;  %v1073_v61 = vadd.f32 %v2529_v1, %v1061_v31 }
 0x195   : > { %1444 = vrot.lane.b32.xlu1 %v1108_v21, %s1906_s15  ;;  %1116 = vst.msk [vmem:[#allocation2 + $0x80] sm:$0xff] %vm432_vm1, %v1108_v21  ;;  %v1031_v29 = vadd.f32 %v1023_v51, %v1003_v20  ;;  %v1051_v56 = vmul.f32 %v2424_v27, %v2597_v33  ;;  %v1778_v30 = vpop.eup %1777  ;;  %v2674_v48 = vrot.slane %v1633_v14, %v2116_v41  ;;  %v1078_v4 = vmul.f32 0.5, %v2608_v7  ;;  %v1301_v41 = vld [vmem:[#allocation2 + $0x10d] sm:$0xff] }
 0x196   : > { %v1211_v62 = vld [vmem:[#allocation2 + $0x4d] sm:$0xff]  ;;  %v2677_v16 = vrot.slane %v1633_v14, %v2934_v53  ;;  %v2680_v39 = vrot.slane %v1633_v14, %v2935_v12  ;;  %v1780_v35 = vpop.eup %1779  ;;  %v1102_v17 = vadd.f32 1.0, %v1778_v30  ;;  %v1089_v42 = vmul.f32 0.70710677, %v1073_v61 }
 0x197   : > { %v1223_v13 = vmul.f32 %v2605_v63, %v1211_v62  ;;  %v1059_v0 = vadd.f32 %v1051_v56, %v1031_v29  ;;  %v1239_v27 = vld [vmem:[#allocation2 + $0x50] sm:$0xff]  ;;  %v1077_v33 = vmul.f32 0.5, %v2611_v45  ;;  %v1101_v2 = vadd.f32 1.0, %v1780_v35 }
 0x198   : > { %v1204_v32 = vadd.f32 %v1196_v58, %v1176_v59  ;;  %v2684_v5 = vadd.f32 %v1197_v46, %v1177_v57  ;;  %v1110_v60 = vmul.f32 %v1102_v17, %v1078_v4  ;;  %1783 = verf.f32 %v1089_v42  ;;  %v1267_v6 = vld [vmem:[#allocation2 + $0x53] sm:$0xff] }
 0x199   : > { %v1071_v53 = vadd.f32 %v2529_v1, %v1059_v0  ;;  %v1231_v12 = vadd.f32 %v1223_v13, %v1203_v25  ;;  %v1212_v22 = vld [vmem:[#allocation2 + $0x65] sm:$0xff]  ;;  %v1109_v7 = vmul.f32 %v1101_v2, %v1077_v33  ;;  %v1142_v52 = vmul.f32 %v1211_v62, %v2410_v9 }
 0x19a   : > { %v1240_v34 = vld [vmem:[#allocation2 + $0x68] sm:$0xff]  ;;  %v1224_v10 = vmul.f32 %v2605_v63, %v1212_v22  ;;  %v1170_v45 = vmul.f32 %v1239_v27, %v2415_v54  ;;  %1448 = vrot.lane.b32.xlu0 %v1110_v60, %s1906_s15  ;;  %1118 = vst.msk [vmem:[#allocation2 + $0xb0] sm:$0xff] %vm432_vm1, %v1110_v60  ;;  %v1251_v26 = vmul.f32 %v2652_v15, %v1239_v27  ;;  %v1080_v25 = vmul.f32 0.5, %v2641_v11 }
 0x19b   : > { %v1087_v19 = vmul.f32 0.70710677, %v1071_v53  ;;  %v2694_v1 = vmul.f32 %v2674_v48, %v1301_v41  ;;  %v2697_v28 = vmul.f32 %v1803_v24, %v2677_v16  ;;  %1446 = vrot.lane.b32.xlu1 %v1109_v7, %s1906_s15  ;;  %1117 = vst.msk [vmem:[#allocation2 + $0x98] sm:$0xff] %vm432_vm1, %v1109_v7  ;;  %v1252_v8 = vmul.f32 %v2652_v15, %v1240_v34  ;;  %v1268_v44 = vld [vmem:[#allocation2 + $0x6b] sm:$0xff] }
 0x19c   : > { %v1232_v3 = vadd.f32 %v1224_v10, %v1204_v32  ;;  %v1213_v43 = vld [vmem:[#allocation2 + $0x7d] sm:$0xff]  ;;  %v2703_v55 = vmul.f32 %v2674_v48, %v1302_v40  ;;  %v2707_v37 = vmul.f32 %v2677_v16, %v2448_v49  ;;  %v1259_v23 = vadd.f32 %v1251_v26, %v1231_v12 }
 0x19d   : > { %1785 = verf.f32 %v1087_v19  ;;  %v1143_v50 = vmul.f32 %v1212_v22, %v2410_v9  ;;  %v2711_v21 = vmul.f32 %v2680_v39, %v1358_v38  ;;  %v1241_v31 = vld [vmem:[#allocation2 + $0x80] sm:$0xff]  ;;  %v1178_v20 = vadd.f32 %v1170_v45, %v1142_v52 }
 0x19e   : > { %v1260_v18 = vadd.f32 %v1252_v8, %v1232_v3  ;;  %v1171_v51 = vmul.f32 %v1240_v34, %v2415_v54  ;;  %v1782_v14 = vpop.eup %1781  ;;  %v1081_v59 = vmul.f32 0.5, %v1073_v61  ;;  %v1279_v58 = vmul.f32 %v2656_v36, %v1267_v6  ;;  %v2718_v46 = vld [vmem:[#allocation2 + $0x83] sm:$0xff] }
 0x19f   : > { %v1280_v49 = vmul.f32 %v2656_v36, %v1268_v44  ;;  %v1225_v57 = vmul.f32 %v2605_v63, %v1213_v43  ;;  %v1104_v29 = vadd.f32 1.0, %v1782_v14  ;;  %v1198_v56 = vmul.f32 %v1267_v6, %v2457_v47  ;;  %v2752_v14 = vld [vmem:[%s2902_s4 + $0x2] ss:$0 sm:$0xff] }
 0x1a0   : > { %v1179_v62 = vadd.f32 %v1171_v51, %v1143_v50  ;;  %v1199_v11 = vmul.f32 %v1268_v44, %v2457_v47  ;;  %v1079_v30 = vmul.f32 0.5, %v1071_v53  ;;  %v1287_v13 = vadd.f32 %v1279_v58, %v1259_v23 }
 0x1a1   : > { %v1288_v35 = vadd.f32 %v1280_v49, %v1260_v18  ;;  %v1253_v4 = vmul.f32 %v2652_v15, %v1241_v31  ;;  %v1112_v61 = vmul.f32 %v1104_v29, %v1080_v25  ;;  %v1297_v17 = vld [vmem:[#allocation2 + $0xad] sm:$0xff]  ;;  %v2727_v27 = vmul.f32 %v2656_v36, %v2718_v46 }
 0x1a2   : > { %v1325_v42 = vld [vmem:[#allocation2 + $0xb0] sm:$0xff]  ;;  %v1206_v33 = vadd.f32 %v1198_v56, %v1178_v20  ;;  %v1207_v2 = vadd.f32 %v1199_v11, %v1179_v62  ;;  %v1784_v32 = vpop.eup %1783  ;;  %v1324_v60 = vld [vmem:[#allocation2 + $0x98] sm:$0xff]  ;;  %v1309_v53 = vmul.f32 %v2674_v48, %v1297_v17  ;;  %v1233_v22 = vadd.f32 %v1225_v57, %v2684_v5 }
 0x1a3   : > { %v2723_v0 = vld [vmem:[#allocation2 + $0xb3] sm:$0xff]  ;;  %v1352_v12 = vld [vmem:[#allocation2 + $0x9b] sm:$0xff]  ;;  %v1227_v34 = vmul.f32 %v1297_v17, %v2605_v63  ;;  %v1144_v40 = vmul.f32 %v1213_v43, %v2410_v9  ;;  %1452 = vrot.lane.b32.xlu0 %v1112_v61, %s1906_s15  ;;  %1120 = vst.msk [vmem:[#allocation2 + $0xe0] sm:$0xff] %vm432_vm1, %v1112_v61  ;;  %v1105_v7 = vadd.f32 1.0, %v1784_v32  ;;  %v1337_v52 = vmul.f32 %v2677_v16, %v1325_v42 }
 0x1a4   : > { %v1296_v41 = vld [vmem:[#allocation2 + $0x95] sm:$0xff]  ;;  %v1172_v45 = vmul.f32 %v1241_v31, %v2415_v54  ;;  %v1336_v38 = vmul.f32 %v2677_v16, %v1324_v60  ;;  %v1317_v19 = vadd.f32 %v1309_v53, %v1288_v35  ;;  %v1365_v5 = vmul.f32 %v2680_v39, %v2723_v0 }
 0x1a5   : > { %v1308_v10 = vmul.f32 %v2674_v48, %v1296_v41  ;;  %v1226_v26 = vmul.f32 %v1296_v41, %v2605_v63  ;;  %v1113_v24 = vmul.f32 %v1105_v7, %v1081_v59  ;;  %v1364_v3 = vmul.f32 %v2680_v39, %v1352_v12 }
 0x1a6   : > { %v1235_v8 = vadd.f32 %v1227_v34, %v1207_v2  ;;  %v1345_v43 = vadd.f32 %v1337_v52, %v1317_v19  ;;  %v1254_v50 = vmul.f32 %v1324_v60, %v2652_v15  ;;  %v1255_v25 = vmul.f32 %v1325_v42, %v2652_v15 }
 0x1a7   : > { %v1316_v6 = vadd.f32 %v1308_v10, %v1287_v13  ;;  %v1786_v44 = vpop.eup %1785  ;;  %v1234_v23 = vadd.f32 %v1226_v26, %v1206_v33  ;;  %1454 = vrot.lane.b32.xlu1 %v1113_v24, %s1906_s15  ;;  %1121 = vst.msk [vmem:[#allocation2 + $0xf8] sm:$0xff] %vm432_vm1, %v1113_v24  ;;  %v1282_v20 = vmul.f32 %v1352_v12, %v2656_v36 }
 0x1a8   : > { %v1103_v18 = vadd.f32 1.0, %v1786_v44  ;;  %v1145_v51 = vmul.f32 %v1296_v41, %v2410_v9  ;;  %v1373_v59 = vadd.f32 %v1365_v5, %v1345_v43  ;;  %v1263_v49 = vadd.f32 %v1255_v25, %v1235_v8  ;;  %v1303_v5 = vld [vmem:[#allocation2 + $0x13d] sm:$0xff] }
 0x1a9   : > { %v1344_v31 = vadd.f32 %v1336_v38, %v1316_v6  ;;  %v1262_v58 = vadd.f32 %v1254_v50, %v1234_v23  ;;  %v1173_v57 = vmul.f32 %v1324_v60, %v2415_v54  ;;  %v1201_v62 = vmul.f32 %v1352_v12, %v2457_v47 }
 0x1aa   : > { %v1111_v29 = vmul.f32 %v1103_v18, %v1079_v30  ;;  %v1146_v11 = vmul.f32 %v1297_v17, %v2410_v9  ;;  %v1385_v13 = vadd.f32 %v2752_v14, %v1373_v59  ;;  %v1299_v61 = vld [vmem:[#allocation2 + $0xdd] sm:$0xff]  ;;  %v1174_v32 = vmul.f32 %v1325_v42, %v2415_v54 }
 0x1ab   : > { %v1372_v56 = vadd.f32 %v1364_v3, %v1344_v31  ;;  %v1290_v35 = vadd.f32 %v1282_v20, %v1262_v58  ;;  %v1327_v33 = vld [vmem:[#allocation2 + $0xe0] sm:$0xff]  ;;  %v1181_v2 = vadd.f32 %v1173_v57, %v1145_v51  ;;  %v1261_v30 = vadd.f32 %v1253_v4, %v1233_v22 }
 0x1ac   : > { %1450 = vrot.lane.b32.xlu1 %v1111_v29, %s1906_s15  ;;  %1119 = vst.msk [vmem:[#allocation2 + $0xc8] sm:$0xff] %vm432_vm1, %v1111_v29  ;;  %v1311_v60 = vmul.f32 %v2674_v48, %v1299_v61  ;;  %v1283_v9 = vmul.f32 %v2723_v0, %v2656_v36  ;;  %v1401_v17 = vmul.f32 0.70710677, %v1385_v13  ;;  %v1355_v12 = vld [vmem:[#allocation2 + $0xe3] sm:$0xff]  ;;  %v1180_v53 = vadd.f32 %v1172_v45, %v1144_v40  ;;  %s1840_s15 = scalar_lea.vmem %s1839_s14, 2048 }
 0x1ad   : > { %v2762_v41 = vadd.f32 %v2752_v14, %v1372_v56  ;;  %v1209_v34 = vadd.f32 %v1201_v62, %v1181_v2  ;;  %v1229_v7 = vmul.f32 %v1299_v61, %v2605_v63  ;;  %v1339_v10 = vmul.f32 %v2677_v16, %v1327_v33  ;;  %p1842_p10 = scmp.lt.s32.totalorder %s1840_s15, %s1834_s28 }
 0x1ae   : > { %v1319_v42 = vadd.f32 %v1311_v60, %v1290_v35  ;;  %v1291_v52 = vadd.f32 %v1283_v9, %v1263_v49  ;;  %1787 = verf.f32 %v1401_v17  ;;  %v1300_v38 = vld [vmem:[#allocation2 + $0xf5] sm:$0xff]  ;;  %v1257_v22 = vmul.f32 %v1327_v33, %v2652_v15 }
 0x1af   : > { %v1400_v54 = vmul.f32 0.70710677, %v2762_v41  ;;  %v1237_v4 = vadd.f32 %v1229_v7, %v1209_v34  ;;  %v1182_v19 = vadd.f32 %v1174_v32, %v1146_v11  ;;  %v1367_v40 = vmul.f32 %v2680_v39, %v1355_v12  ;;  %v1328_v24 = vld [vmem:[#allocation2 + $0xf8] sm:$0xff]  ;;  %p1843_p0 = por %p1842_p10, %p1841_p8 }
 0x1b0   : > { %v1347_v26 = vadd.f32 %v1339_v10, %v1319_v42  ;;  %v1312_v45 = vmul.f32 %v2674_v48, %v1300_v38  ;;  %v1356_v6 = vld [vmem:[#allocation2 + $0xfb] sm:$0xff]  ;;  %v1200_v3 = vmul.f32 %v2718_v46, %v2457_v47  ;;  %v1285_v44 = vmul.f32 %v1355_v12, %v2656_v36  ;;  %v1357_v10 = vld [vmem:[#allocation2 + $0x113] sm:$0xff] }
 0x1b1   : > { %1789 = verf.f32 %v1400_v54  ;;  %v1265_v8 = vadd.f32 %v1257_v22, %v1237_v4  ;;  %v1202_v43 = vmul.f32 %v2723_v0, %v2457_v47  ;;  %v1289_v23 = vadd.f32 %v2727_v27, %v1261_v30  ;;  %p1844_p2 = pnand %p1843_p0, %p1837_p13 }
 0x1b2   : > { %v1375_v50 = vadd.f32 %v1367_v40, %v1347_v26  ;;  %v1320_v25 = vadd.f32 %v1312_v45, %v1291_v52  ;;  %v1315_v18 = vmul.f32 %v2674_v48, %v1303_v5  ;;  %v1340_v51 = vmul.f32 %v2677_v16, %v1328_v24 }
 0x1b3   : > { %v1298_v31 = vld [vmem:[#allocation2 + $0xc5] sm:$0xff]  ;;  %v1208_v59 = vadd.f32 %v1200_v3, %v1180_v53  ;;  %v1293_v58 = vadd.f32 %v1285_v44, %v1265_v8  ;;  %v1210_v49 = vadd.f32 %v1202_v43, %v1182_v19  ;;  %v1393_v46 = vmul.f32 0.5, %v1385_v13 }
 0x1b4   : > { %v1326_v20 = vld [vmem:[#allocation2 + $0xc8] sm:$0xff]  ;;  %v1310_v57 = vmul.f32 %v2674_v48, %v1298_v31  ;;  %v1387_v29 = vadd.f32 %v2752_v14, %v1375_v50  ;;  %v1368_v47 = vmul.f32 %v2680_v39, %v1356_v6  ;;  %v1348_v27 = vadd.f32 %v1340_v51, %v1320_v25 }
 0x1b5   : > { %v1354_v0 = vld [vmem:[#allocation2 + $0xcb] sm:$0xff]  ;;  %v1228_v56 = vmul.f32 %v1298_v31, %v2605_v63  ;;  %v1230_v62 = vmul.f32 %v1300_v38, %v2605_v63  ;;  %v1258_v11 = vmul.f32 %v1328_v24, %v2652_v15  ;;  %v1338_v61 = vmul.f32 %v2677_v16, %v1326_v20  ;;  %v1331_v38 = vld [vmem:[#allocation2 + $0x140] sm:$0xff] }
 0x1b6   : > { %v1318_v35 = vadd.f32 %v1310_v57, %v1289_v23  ;;  %v1403_v33 = vmul.f32 0.70710677, %v1387_v29  ;;  %v1322_v13 = vadd.f32 %v2703_v55, %v1293_v58  ;;  %v1376_v2 = vadd.f32 %v1368_v47, %v1348_v27  ;;  %v1359_v24 = vld [vmem:[#allocation2 + $0x143] sm:$0xff] }
 0x1b7   : > { %v1236_v48 = vadd.f32 %v1228_v56, %v1208_v59  ;;  %v1256_v32 = vmul.f32 %v1326_v20, %v2652_v15  ;;  %v1238_v30 = vadd.f32 %v1230_v62, %v1210_v49  ;;  %v1366_v9 = vmul.f32 %v2680_v39, %v1354_v0 }
 0x1b8   : > { %v1346_v60 = vadd.f32 %v1338_v61, %v1318_v35  ;;  %1791 = verf.f32 %v1403_v33  ;;  %v1350_v17 = vadd.f32 %v2707_v37, %v1322_v13  ;;  %v1788_v63 = vpop.eup %1787  ;;  %v1388_v12 = vadd.f32 %v2752_v14, %v1376_v2 }
 0x1b9   : > { %v1264_v53 = vadd.f32 %v1256_v32, %v1236_v48  ;;  %v1284_v34 = vmul.f32 %v1354_v0, %v2656_v36  ;;  %v1266_v7 = vadd.f32 %v1258_v11, %v1238_v30  ;;  %v1417_v55 = vadd.f32 1.0, %v1788_v63 }
 0x1ba   : > { %v1374_v42 = vadd.f32 %v1366_v9, %v1346_v60  ;;  %v1378_v15 = vadd.f32 %v2711_v21, %v1350_v17  ;;  %v1286_v52 = vmul.f32 %v1356_v6, %v2656_v36  ;;  %v1392_v4 = vmul.f32 0.5, %v2762_v41 }
 0x1bb   : > { %v1790_v54 = vpop.eup %1789  ;;  %v1404_v37 = vmul.f32 0.70710677, %v1388_v12  ;;  %v1292_v19 = vadd.f32 %v1284_v34, %v1264_v53  ;;  %v1425_v5 = vmul.f32 %v1417_v55, %v1393_v46  ;;  %v1369_v21 = vmul.f32 %v2680_v39, %v1357_v10  ;;  %v2944_v10 = vld [vmem:[#allocation14_spill] sm:$0xff] }
 0x1bc   : > { %v1416_v22 = vadd.f32 1.0, %v1790_v54  ;;  %v1386_v26 = vadd.f32 %v2752_v14, %v1374_v42  ;;  %v1390_v40 = vadd.f32 %v2752_v14, %v1378_v15  ;;  %v1294_v45 = vadd.f32 %v1286_v52, %v1266_v7  ;;  %v2943_v54 = vld [vmem:[#allocation13_spill] sm:$0xff] }
 0x1bd   : > { %v1321_v8 = vadd.f32 %v2694_v1, %v1292_v19  ;;  %v1343_v36 = vmul.f32 %v2677_v16, %v1331_v38  ;;  %1474 = vrot.lane.b32.xlu1 %v1425_v5, %s1907_s29  ;;  %1793 = verf.f32 %v1404_v37  ;;  %v1371_v43 = vmul.f32 %v2680_v39, %v1359_v24 }
 0x1be   : > { %v1424_v3 = vmul.f32 %v1416_v22, %v1392_v4  ;;  %v1402_v41 = vmul.f32 0.70710677, %v1386_v26  ;;  %v1323_v44 = vadd.f32 %v1315_v18, %v1294_v45  ;;  %v1406_v23 = vmul.f32 0.70710677, %v1390_v40  ;;  %v2945_v22 = vld [vmem:[#allocation16_spill] sm:$0xff] }
 0x1bf   : > { %v1349_v6 = vadd.f32 %v2697_v28, %v1321_v8  ;;  %v1395_v31 = vmul.f32 0.5, %v1387_v29  ;;  %v1394_v46 = vmul.f32 0.5, %v1386_v26  ;;  %v1396_v27 = vmul.f32 0.5, %v1388_v12  ;;  %v2946_v26 = vld [vmem:[#allocation9_spill] sm:$0xff] }
 0x1c0   : > { %1472 = vrot.lane.b32.xlu0 %v1424_v3, %s1907_s29  ;;  %1795 = verf.f32 %v1402_v41  ;;  %v1351_v1 = vadd.f32 %v1343_v36, %v1323_v44  ;;  %v1398_v33 = vmul.f32 0.5, %v1390_v40  ;;  %v2947_v3 = vld [vmem:[#allocation10_spill] sm:$0xff]  ;;  %v2948_v41 = vld [vmem:[#allocation17_spill] sm:$0xff] }
 0x1c1   : > { %v1377_v50 = vadd.f32 %v1369_v21, %v1349_v6  ;;  %1797 = verf.f32 %v1406_v23 }
 0x1c2   : > { %v1792_v25 = vpop.eup %1791  ;;  %v1379_v51 = vadd.f32 %v1371_v43, %v1351_v1  ;;  %v2949_v43 = vld [vmem:[#allocation11_spill] sm:$0xff] }
 0x1c3   : > { %v1419_v20 = vadd.f32 1.0, %v1792_v25  ;;  %v1389_v16 = vadd.f32 %v2752_v14, %v1377_v50 }
 0x1c4   : > { %v1391_v49 = vadd.f32 %v2752_v14, %v1379_v51 }
 0x1c5   : > { %v1427_v59 = vmul.f32 %v1419_v20, %v1395_v31  ;;  %v1405_v58 = vmul.f32 0.70710677, %v1389_v16  ;;  %v1397_v35 = vmul.f32 0.5, %v1389_v16  ;;  %v2950_v31 = vld [vmem:[#allocation15_spill] sm:$0xff] }
 0x1c6   : > { %v1407_v28 = vmul.f32 0.70710677, %v1391_v49  ;;  %v1399_v32 = vmul.f32 0.5, %v1391_v49 }
 0x1c7   : > { %1478 = vrot.lane.b32.xlu1 %v1427_v59, %s1907_s29  ;;  %1799 = verf.f32 %v1405_v58  ;;  %v1794_v39 = vpop.eup %1793 }
 0x1c8   : > { %1801 = verf.f32 %v1407_v28  ;;  %v1420_v29 = vadd.f32 1.0, %v1794_v39 }
 0x1ca   : > { %v1796_v18 = vpop.eup %1795  ;;  %v1428_v62 = vmul.f32 %v1420_v29, %v1396_v27 }
 0x1cb   : > { %v1418_v57 = vadd.f32 1.0, %v1796_v18  ;;  %v1798_v0 = vpop.eup %1797 }
 0x1cc   : > { %v1422_v11 = vadd.f32 1.0, %v1798_v0 }
 0x1cd   : > { %v1426_v47 = vmul.f32 %v1418_v57, %v1394_v46 }
 0x1ce   : > { %v1430_v48 = vmul.f32 %v1422_v11, %v1398_v33 }
 0x1cf   : > { %1476 = vrot.lane.b32.xlu0 %v1426_v47, %s1907_s29 }
 0x1d1   : > { %v1800_v56 = vpop.eup %1799 }
 0x1d2   : > { %v1421_v14 = vadd.f32 1.0, %v1800_v56  ;;  %v1802_v61 = vpop.eup %1801 }
 0x1d3   : > { %1480 = vrot.lane.b32.xlu0 %v1428_v62, %s1907_s29  ;;  %v1423_v2 = vadd.f32 1.0, %v1802_v61 }
 0x1d4   : > { %v1429_v13 = vmul.f32 %v1421_v14, %v1397_v35 }
 0x1d5   : > { %v1431_v30 = vmul.f32 %v1423_v2, %v1399_v32 }
 0x1d6   : > { %1482 = vrot.lane.b32.xlu1 %v1429_v13, %s1907_s29 }
 0x1d7   : > { %1484 = vrot.lane.b32.xlu0 %v1430_v48, %s1907_s29 }
 0x1da   : > { %1486 = vrot.lane.b32.xlu1 %v1431_v30, %s1907_s29 }
 0x201   : > { %v1441_v9 = vpop.permute.xlu0 %1440 }
 0x202   : > { %v1496_v15 = vsel %vm432_vm1, %v2944_v10, %v1441_v9 }
 0x205   : > { %v1443_v63 = vpop.permute.xlu0 %1442 }
 0x206   : > { %v1497_v55 = vsel %vm432_vm1, %v2943_v54, %v1443_v63 }
 0x207   : > { %v1445_v60 = vpop.permute.xlu1 %1444 }
 0x208   : > { %v1498_v40 = vsel %vm432_vm1, %v2946_v26, %v1445_v60 }
 0x20c   : > { %v1449_v53 = vpop.permute.xlu0 %1448 }
 0x20d   : > { %v1447_v17 = vpop.permute.xlu1 %1446  ;;  %v1500_v8 = vsel %vm432_vm1, %v2947_v3, %v1449_v53 }
 0x20e   : > { %v1499_v37 = vsel %vm432_vm1, %v2945_v22, %v1447_v17 }
 0x215   : > { %v1453_v7 = vpop.permute.xlu0 %1452 }
 0x216   : > { %v1502_v23 = vsel %vm432_vm1, %v2949_v43, %v1453_v7 }
 0x219   : > { %v1455_v12 = vpop.permute.xlu1 %1454 }
 0x21a   : > { %v1503_v20 = vsel %vm432_vm1, %v2950_v31, %v1455_v12 }
 0x21e   : > { %v1451_v34 = vpop.permute.xlu1 %1450 }
 0x21f   : > { %v1501_v6 = vsel %vm432_vm1, %v2948_v41, %v1451_v34 }
 0x22f   : > { %v1475_v42 = vpop.permute.xlu1 %1474 }
 0x230   : > { %v1505_v38 = vsel %vm262_vm0, %v1497_v55, %v1475_v42 }
 0x231   : > { %1514 = vst.msk [vmem:[%s242_s10 + $0x8] sm:$0xff] %vm1512_vm3, %v1505_v38 }
 0x232   : > { %v1473_v52 = vpop.permute.xlu0 %1472 }
 0x233   : > { %v1504_v4 = vsel %vm262_vm0, %v1496_v15, %v1473_v52 }
 0x234   : > { %1513 = vst.msk [vmem:[%s242_s10] sm:$0xff] %vm1512_vm3, %v1504_v4 }
 0x239   : > { %v1479_v19 = vpop.permute.xlu1 %1478 }
 0x23a   : > { %v1507_v5 = vsel %vm262_vm0, %v1499_v37, %v1479_v19 }
 0x23b   : > { %1516 = vst.msk [vmem:[%s242_s10 + $0x18] sm:$0xff] %vm1512_vm3, %v1507_v5 }
 0x241   : > { %v1477_v45 = vpop.permute.xlu0 %1476 }
 0x242   : > { %v1506_v24 = vsel %vm262_vm0, %v1498_v40, %v1477_v45 }
 0x243   : > { %1515 = vst.msk [vmem:[%s242_s10 + $0x10] sm:$0xff] %vm1512_vm3, %v1506_v24 }
 0x245   : > { %v1481_v21 = vpop.permute.xlu0 %1480 }
 0x246   : > { %v1508_v36 = vsel %vm262_vm0, %v1500_v8, %v1481_v21 }
 0x247   : > { %1517 = vst.msk [vmem:[%s242_s10 + $0x20] sm:$0xff] %vm1512_vm3, %v1508_v36 }
 0x248   : > { %v1483_v44 = vpop.permute.xlu1 %1482 }
 0x249   : > { %v1509_v50 = vsel %vm262_vm0, %v1501_v6, %v1483_v44  ;;  %v1485_v1 = vpop.permute.xlu0 %1484 }
 0x24a   : > { %1518 = vst.msk [vmem:[%s242_s10 + $0x28] sm:$0xff] %vm1512_vm3, %v1509_v50  ;;  %v1510_v25 = vsel %vm262_vm0, %v1502_v23, %v1485_v1 }
 0x24b   : > { %1519 = vst.msk [vmem:[%s242_s10 + $0x30] sm:$0xff] %vm1512_vm3, %v1510_v25 }
 0x24c   : > { %v1487_v16 = vpop.permute.xlu1 %1486 }
 0x24d   : > { %v1511_v51 = vsel %vm262_vm0, %v1503_v20, %v1487_v16 }
 0x24e   : > { %1520 = vst.msk [vmem:[%s242_s10 + $0x38] sm:$0xff] %vm1512_vm3, %v1511_v51 }
 0x24f   : > { %1847 = shalt.err (!%p1844_p2)
}
 0x250   : > { %s1848_s16 = scalar_lea.hbm %s2850_s17, 1024  ;;  %s1852_s9 = scalar_lea.hbm %s2903_s5, 2048 }
 0x251   : > { %p1849_p4 = scmp.ne.s32.totalorder %s2850_s17, %s1848_s16  ;;  %p1853_p9 = scmp.lt.u32.totalorder %s2850_s17, %s2903_s5 }
 0x252   : > { %p1854_p1 = scmp.lt.u32.totalorder %s1852_s9, %s1848_s16  ;;  %p1856_p6 = scmp.lt.u32.totalorder %s1848_s16, %s2850_s17 }
 0x253   : > { %p1850_p5 = pnand %p1849_p4, %p2951_p11 }
 0x254   : > { %p1855_p3 = por %p1854_p1, %p1853_p9 }
 0x255   : > { %p1851_p7 = pneg %p1850_p5 }
 0x256   : > { %p1857_p12 = por %p1856_p6, %p1855_p3 }
 0x258   : > { %p1858_p13 = pnand %p1857_p12, %p1851_p7 }
 0x25a   : > { %1861 = shalt.err (!%p1858_p13)
}
 0x25b   : > { %s1909_s11 = smov 128   ;;  %s1910_s13 = smov 8  }
 0x25c   : > { %1688 = dma.vmem_to_hbm [thread:$0]  (%p2951_p11), %s2842_s25, 1024, %s2850_s17, %s1522_s26, %s1909_s11, %s1909_s11, %s1910_s13  }
 0x25d PF: > { %s1550_s22 = sand.u32 1, %s1888_s18   ;;  %p2952_p8 = scmp.ne.s32.totalorder %s2923_s6, 0 }
 0x25e   : > { %p2953_p10 = scmp.ge.s32.totalorder %s1900_s21, 2  ;;  %s1551_s28 = scalar_lea.sflag [#allocation5], %s1550_s22 }
 0x260   : > { %p1695_p0 = pnand %p2953_p10, %p2952_p8 }
 0x262   : > { %1883 = dma.done.wait (!%p1695_p0), %s1551_s28, 1024  }
 0x263   : > { %1885 = vsyncadd (!%p1695_p0), %s1551_s28, 4294966272  ;;  %p18_p2 = scmp.ge.s32.totalorder %s1966_s24, 4   ;;  %s2954_s18 = smov %s1892_s19 }
 0x264   : > { %s2955_s19 = smov %s1896_s20  ;;  %s2956_s20 = smov %s1978_s27 }
 0x265   : > { %s2957_s21 = smov %s1966_s24  ;;  %20 = sbr.rel (!%p18_p2) target bundleno = 5 (0x5), region = 93 }
 0x26c   :  { %1556 = vsyncpa [#allocation4], 1 }
 0x26d   :  { %1558 = vsyncpa [#allocation4 + $0x1], 1 }
 0x26e   :  { %1559 = vsyncpa [#allocation5], 1 }
 0x26f   :  { %1561 = vsyncpa [#allocation5 + $0x1], 1 }

</bundles_post_ra>
